<compile_context>
chip_gen: v7x
topology: tpu7x:2x2x1
jax: 0.10.0
libtpu: 0.0.40
codegen_flags: <defaults>
</compile_context>

<pallas_src>
import jax
import jax.numpy as jnp
from jax.experimental import pallas as pl
from jax.experimental.pallas import tpu as pltpu


# ---------------------------------------------------------------------------
# Kernel: all three decoders (Linear/ReLU x3 + Linear/Sigmoid), each applied
# to the stacked [z_x_d ; z_s] batch, unrolled in one invocation.
# ---------------------------------------------------------------------------
def _decoder_cada_kernel(zx1_ref, zx2_ref, zx3_ref, zs_ref,
                         w1_ref, b1_ref, w2_ref, b2_ref, w3_ref, b3_ref,
                         w4a_ref, b4a_ref, w4b_ref, b4b_ref, w4c_ref, b4c_ref,
                         ox1_ref, ox2_ref, ox3_ref,
                         os1_ref, os2_ref, os3_ref):
    B = zs_ref.shape[0]
    zs = zs_ref[...]                                     # f32 (B, Z), loaded once

    zx_refs = (zx1_ref, zx2_ref, zx3_ref)
    last_refs = ((w4a_ref, b4a_ref), (w4b_ref, b4b_ref), (w4c_ref, b4c_ref))
    out_refs = ((ox1_ref, os1_ref), (ox2_ref, os2_ref), (ox3_ref, os3_ref))

    for d in range(3):                                   # unrolled decoders
        # [z_x_d ; z_s] built in registers (f32 concat is vreg-aligned),
        # then a single cast to bf16 for the MXU. No VMEM scratch bounce.
        h = jnp.concatenate([zx_refs[d][...], zs], axis=0).astype(jnp.bfloat16)

        # Three hidden layers: bf16 matmul, f32 accumulate, f32 bias, ReLU.
        for w_ref, b_ref in ((w1_ref, b1_ref), (w2_ref, b2_ref), (w3_ref, b3_ref)):
            y = jnp.dot(h, w_ref[d], preferred_element_type=jnp.float32)
            h = jnp.maximum(y + b_ref[d], 0.0).astype(jnp.bfloat16)

        # Last layer at this decoder's TRUE output width + sigmoid epilogue.
        w4_ref, b4_ref = last_refs[d]
        logits = jnp.dot(h, w4_ref[...],
                         preferred_element_type=jnp.float32) + b4_ref[...]
        # sigmoid via EUP exp + EUP approx reciprocal (keeps epilogue off the
        # VPU divide path). Use approx=False if feeding a training loss that
        # needs exact sigmoid.
        y = pl.reciprocal(1.0 + jnp.exp(-logits), approx=True)

        ox_ref, os_ref = out_refs[d]
        ox_ref[...] = y[:B, :].astype(ox_ref.dtype)
        os_ref[...] = y[B:, :].astype(os_ref.dtype)


# ---------------------------------------------------------------------------
# Wrapper: one pallas_call, everything resident in VMEM (no grid).
# ---------------------------------------------------------------------------
def decoder_cada_forward(z_x1, z_x2, z_x3, z_s, params):
    """Mirrors decoder_cada.forward with a single fused kernel launch.

    params = (stacked, last) from prepare_params(). Returns six f32 arrays:
    (recon_x1, recon_x2, recon_x3, recon_s1, recon_s2, recon_s3).
    """
    stacked, last = params
    (w1, b1), (w2, b2), (w3, b3) = stacked
    (w4a, b4a), (w4b, b4b), (w4c, b4c) = last

    B, _ = z_s.shape
    M = 2 * B
    out_dims = (w4a.shape[1], w4b.shape[1], w4c.shape[1])

    inputs = (z_x1, z_x2, z_x3, z_s,
              w1, b1, w2, b2, w3, b3,
              w4a, b4a, w4b, b4b, w4c, b4c)

    # bf16 outputs at true widths (multiples of 128 -> unmasked lane-dense
    # stores); the f32 cast for downstream parity happens in the wrapper.
    out_shape = tuple(
        jax.ShapeDtypeStruct((B, d), jnp.bfloat16)
        for d in (out_dims[0], out_dims[1], out_dims[2],
                  out_dims[0], out_dims[1], out_dims[2]))

    # Advisory cost estimate (real, unpadded shapes) so XLA schedules around
    # this tiny custom call.
    per_dec_hidden_k = (w1.shape[1] * w1.shape[2] + w2.shape[1] * w2.shape[2]
                        + w3.shape[1] * w3.shape[2])
    last_k = sum(int(w.shape[0] * w.shape[1]) for w in (w4a, w4b, w4c))
    flops = 2 * M * (3 * per_dec_hidden_k + last_k)
    transcendentals = M * sum(out_dims)
    bytes_accessed = (sum(int(a.size) * a.dtype.itemsize for a in inputs)
                      + 2 * M * sum(out_dims))           # bf16 outputs

    vmem_spec = pl.BlockSpec(memory_space=pltpu.MemorySpace.VMEM)

    outs = pl.pallas_call(
        _decoder_cada_kernel,
        out_shape=out_shape,
        in_specs=[vmem_spec] * len(inputs),
        out_specs=[vmem_spec] * len(out_shape),
        cost_estimate=pl.CostEstimate(
            flops=flops,
            transcendentals=transcendentals,
            bytes_accessed=bytes_accessed),
    )(*inputs)

    return tuple(o.astype(jnp.float32) for o in outs)


# ---------------------------------------------------------------------------
# Parameter construction / preparation (deterministic, synthetic).
# ---------------------------------------------------------------------------
def make_decoder_params(key, dims):
    """dims = [z, h2, h1, h0, out]; returns list of 4 (W, b), W:[in,out] f32."""
    params = []
    for i in range(len(dims) - 1):
        key, kw, kb = jax.random.split(key, 3)
        fan_in, fan_out = dims[i], dims[i + 1]
        bound = 1.0 / jnp.sqrt(fan_in)
        w = jax.random.uniform(kw, (fan_in, fan_out), jnp.float32, -bound, bound)
        b = jax.random.uniform(kb, (1, fan_out), jnp.float32, -bound, bound)
        params.append((w, b))
    return params


def prepare_params(decoders):
    """Layers 0-2 (same shapes for all decoders) -> stacked bf16 [3,in,out]
    weights + f32 [3,1,out] biases (one contiguous slab each, no padding).
    Last layer kept per decoder, UNPADDED, bf16 weight / f32 bias."""
    stacked = []
    for layer in range(3):
        ws = jnp.stack([d[layer][0] for d in decoders]).astype(jnp.bfloat16)
        bs = jnp.stack([d[layer][1] for d in decoders]).astype(jnp.float32)
        stacked.append((ws, bs))
    last = tuple((d[3][0].astype(jnp.bfloat16), d[3][1].astype(jnp.float32))
                 for d in decoders)
    return stacked, last


# ---------------------------------------------------------------------------
# Pure-JAX reference (mirrors the kernel's bf16-matmul / f32-accumulate path).
# ---------------------------------------------------------------------------
def ref_mlp(x, params):
    h = x.astype(jnp.bfloat16)
    n = len(params)
    for i, (w, b) in enumerate(params):
        y = jnp.dot(h, w.astype(jnp.bfloat16),
                    preferred_element_type=jnp.float32) + b
        if i < n - 1:
            h = jnp.maximum(y, 0.0).astype(jnp.bfloat16)
        else:
            y = jax.nn.sigmoid(y)
    return y


if __name__ == "__main__":
    # Small, TPU-friendly shapes consistent with the module (scaled down from
    # z=10, hidden=[2000, 1024, 500]).
    # TODO(synk): at production scale (hidden=[2000,1024,500], large input_dim):
    #   (a) tile w3/w4 over output-N with grid=(n_dec, N//tn) ('arbitrary' N
    #       axis, hidden h computed once under pl.when(j==0) into persistent
    #       VMEM) and set vmem_limit_bytes from pltpu.get_tpu_info();
    #   (b) on v7x (2 TCs) restore a 'parallel' decoder/N grid axis with the
    #       heaviest decoder load-balanced against the two lightest;
    #   (c) consider int8 (v5e/v6e) or fp8 (v7x) weights + per-channel scales
    #       to halve weight HBM bytes on this bandwidth-bound kernel.
    Z = 128                      # latent dim
    HIDDEN = [256, 128, 128]     # hidden_dim[0], hidden_dim[1], hidden_dim[2]
    INPUT_DIM = [256, 128, 384]  # input_dim[0], input_dim[1], input_dim[2]
    BATCH = 8

    root = jax.random.PRNGKey(0)
    k_p1, k_p2, k_p3, k_x1, k_x2, k_x3, k_s = jax.random.split(root, 7)

    # decoder_i: Linear(z,h[2]) -> Linear(h[2],h[1]) -> Linear(h[1],h[0]) -> Linear(h[0],input_dim[i])
    dec1 = make_decoder_params(k_p1, [Z, HIDDEN[2], HIDDEN[1], HIDDEN[0], INPUT_DIM[0]])
    dec2 = make_decoder_params(k_p2, [Z, HIDDEN[2], HIDDEN[1], HIDDEN[0], INPUT_DIM[1]])
    dec3 = make_decoder_params(k_p3, [Z, HIDDEN[2], HIDDEN[1], HIDDEN[0], INPUT_DIM[2]])
    params = prepare_params([dec1, dec2, dec3])

    z_x1 = jax.random.normal(k_x1, (BATCH, Z), jnp.float32)
    z_x2 = jax.random.normal(k_x2, (BATCH, Z), jnp.float32)
    z_x3 = jax.random.normal(k_x3, (BATCH, Z), jnp.float32)
    z_s = jax.random.normal(k_s, (BATCH, Z), jnp.float32)

    fwd = jax.jit(decoder_cada_forward)
    outs = jax.block_until_ready(fwd(z_x1, z_x2, z_x3, z_s, params))

    # Verify against a pure-JAX reference of the same forward pass.
    refs = (
        ref_mlp(z_x1, dec1), ref_mlp(z_x2, dec2), ref_mlp(z_x3, dec3),
        ref_mlp(z_s, dec1), ref_mlp(z_s, dec2), ref_mlp(z_s, dec3),
    )
    expected_shapes = [
        (BATCH, INPUT_DIM[0]), (BATCH, INPUT_DIM[1]), (BATCH, INPUT_DIM[2]),
        (BATCH, INPUT_DIM[0]), (BATCH, INPUT_DIM[1]), (BATCH, INPUT_DIM[2]),
    ]
    # Tolerance covers approx-reciprocal sigmoid + bf16 output rounding on top
    # of the shared bf16-matmul path.
    for o, r, s in zip(outs, refs, expected_shapes):
        assert o.shape == s, (o.shape, s)
        assert o.dtype == jnp.float32
        err = float(jnp.max(jnp.abs(o - r)))
        assert err < 1e-2, err

    print("KERNEL_OK")
</pallas_src>

<mosaic_0001>
module attributes {stable_mosaic.version = 11 : i64} {
  func.func @_decoder_cada_kernel(%arg0: memref<8x128xf32, #tpu.memory_space<vmem>>, %arg1: memref<8x128xf32, #tpu.memory_space<vmem>>, %arg2: memref<8x128xf32, #tpu.memory_space<vmem>>, %arg3: memref<8x128xf32, #tpu.memory_space<vmem>>, %arg4: memref<3x128x128xbf16, #tpu.memory_space<vmem>>, %arg5: memref<3x1x128xf32, #tpu.memory_space<vmem>>, %arg6: memref<3x128x128xbf16, #tpu.memory_space<vmem>>, %arg7: memref<3x1x128xf32, #tpu.memory_space<vmem>>, %arg8: memref<3x128x256xbf16, #tpu.memory_space<vmem>>, %arg9: memref<3x1x256xf32, #tpu.memory_space<vmem>>, %arg10: memref<256x256xbf16, #tpu.memory_space<vmem>>, %arg11: memref<1x256xf32, #tpu.memory_space<vmem>>, %arg12: memref<256x128xbf16, #tpu.memory_space<vmem>>, %arg13: memref<1x128xf32, #tpu.memory_space<vmem>>, %arg14: memref<256x384xbf16, #tpu.memory_space<vmem>>, %arg15: memref<1x384xf32, #tpu.memory_space<vmem>>, %arg16: memref<8x256xbf16, #tpu.memory_space<vmem>>, %arg17: memref<8x128xbf16, #tpu.memory_space<vmem>>, %arg18: memref<8x384xbf16, #tpu.memory_space<vmem>>, %arg19: memref<8x256xbf16, #tpu.memory_space<vmem>>, %arg20: memref<8x128xbf16, #tpu.memory_space<vmem>>, %arg21: memref<8x384xbf16, #tpu.memory_space<vmem>>) attributes {dimension_semantics = [], scalar_prefetch = 0 : i64, scratch_operands = 0 : i64, tpu.core_type = #tpu.core_type<tc>} {
    %c0 = arith.constant 0 : index
    %c0_0 = arith.constant 0 : index
    %0 = vector.load %arg3[%c0, %c0_0] : memref<8x128xf32, #tpu.memory_space<vmem>>, vector<8x128xf32>
    %c0_1 = arith.constant 0 : index
    %c0_2 = arith.constant 0 : index
    %1 = vector.load %arg0[%c0_1, %c0_2] : memref<8x128xf32, #tpu.memory_space<vmem>>, vector<8x128xf32>
    %2 = tpu.concatenate %1, %0 in 0 : vector<8x128xf32>, vector<8x128xf32> -> vector<16x128xf32>
    %3 = arith.truncf %2 : vector<16x128xf32> to vector<16x128xbf16>
    %c0_3 = arith.constant 0 : index
    %c0_4 = arith.constant 0 : index
    %c0_5 = arith.constant 0 : index
    %4 = vector.load %arg4[%c0_3, %c0_4, %c0_5] : memref<3x128x128xbf16, #tpu.memory_space<vmem>>, vector<1x128x128xbf16>
    %5 = vector.shape_cast %4 : vector<1x128x128xbf16> to vector<128x128xbf16>
    %cst = arith.constant dense<0.000000e+00> : vector<16x128xf32>
    %6 = tpu.matmul %3, %5, %cst {dimension_numbers = #tpu.dot_dimension_numbers<[1], [0], [0], [1], [0, 0, 1, 1], [], []>} : vector<16x128xbf16>, vector<128x128xbf16>, vector<16x128xf32> -> vector<16x128xf32>
    %c0_6 = arith.constant 0 : index
    %c0_7 = arith.constant 0 : index
    %c0_8 = arith.constant 0 : index
    %7 = vector.load %arg5[%c0_6, %c0_7, %c0_8] : memref<3x1x128xf32, #tpu.memory_space<vmem>>, vector<1x1x128xf32>
    %8 = vector.shape_cast %7 : vector<1x1x128xf32> to vector<1x128xf32>
    %9 = vector.broadcast %8 : vector<1x128xf32> to vector<16x128xf32>
    %10 = arith.addf %6, %9 : vector<16x128xf32>
    %cst_9 = arith.constant 0.000000e+00 : f32
    %11 = vector.broadcast %cst_9 : f32 to vector<16x128xf32>
    %12 = arith.maximumf %10, %11 : vector<16x128xf32>
    %13 = arith.truncf %12 : vector<16x128xf32> to vector<16x128xbf16>
    %c0_10 = arith.constant 0 : index
    %c0_11 = arith.constant 0 : index
    %c0_12 = arith.constant 0 : index
    %14 = vector.load %arg6[%c0_10, %c0_11, %c0_12] : memref<3x128x128xbf16, #tpu.memory_space<vmem>>, vector<1x128x128xbf16>
    %15 = vector.shape_cast %14 : vector<1x128x128xbf16> to vector<128x128xbf16>
    %cst_13 = arith.constant dense<0.000000e+00> : vector<16x128xf32>
    %16 = tpu.matmul %13, %15, %cst_13 {dimension_numbers = #tpu.dot_dimension_numbers<[1], [0], [0], [1], [0, 0, 1, 1], [], []>} : vector<16x128xbf16>, vector<128x128xbf16>, vector<16x128xf32> -> vector<16x128xf32>
    %c0_14 = arith.constant 0 : index
    %c0_15 = arith.constant 0 : index
    %c0_16 = arith.constant 0 : index
    %17 = vector.load %arg7[%c0_14, %c0_15, %c0_16] : memref<3x1x128xf32, #tpu.memory_space<vmem>>, vector<1x1x128xf32>
    %18 = vector.shape_cast %17 : vector<1x1x128xf32> to vector<1x128xf32>
    %19 = vector.broadcast %18 : vector<1x128xf32> to vector<16x128xf32>
    %20 = arith.addf %16, %19 : vector<16x128xf32>
    %cst_17 = arith.constant 0.000000e+00 : f32
    %21 = vector.broadcast %cst_17 : f32 to vector<16x128xf32>
    %22 = arith.maximumf %20, %21 : vector<16x128xf32>
    %23 = arith.truncf %22 : vector<16x128xf32> to vector<16x128xbf16>
    %c0_18 = arith.constant 0 : index
    %c0_19 = arith.constant 0 : index
    %c0_20 = arith.constant 0 : index
    %24 = vector.load %arg8[%c0_18, %c0_19, %c0_20] : memref<3x128x256xbf16, #tpu.memory_space<vmem>>, vector<1x128x256xbf16>
    %25 = vector.shape_cast %24 : vector<1x128x256xbf16> to vector<128x256xbf16>
    %cst_21 = arith.constant dense<0.000000e+00> : vector<16x256xf32>
    %26 = tpu.matmul %23, %25, %cst_21 {dimension_numbers = #tpu.dot_dimension_numbers<[1], [0], [0], [1], [0, 0, 1, 1], [], []>} : vector<16x128xbf16>, vector<128x256xbf16>, vector<16x256xf32> -> vector<16x256xf32>
    %c0_22 = arith.constant 0 : index
    %c0_23 = arith.constant 0 : index
    %c0_24 = arith.constant 0 : index
    %27 = vector.load %arg9[%c0_22, %c0_23, %c0_24] : memref<3x1x256xf32, #tpu.memory_space<vmem>>, vector<1x1x256xf32>
    %28 = vector.shape_cast %27 : vector<1x1x256xf32> to vector<1x256xf32>
    %29 = vector.broadcast %28 : vector<1x256xf32> to vector<16x256xf32>
    %30 = arith.addf %26, %29 : vector<16x256xf32>
    %cst_25 = arith.constant 0.000000e+00 : f32
    %31 = vector.broadcast %cst_25 : f32 to vector<16x256xf32>
    %32 = arith.maximumf %30, %31 : vector<16x256xf32>
    %33 = arith.truncf %32 : vector<16x256xf32> to vector<16x256xbf16>
    %c0_26 = arith.constant 0 : index
    %c0_27 = arith.constant 0 : index
    %34 = vector.load %arg10[%c0_26, %c0_27] : memref<256x256xbf16, #tpu.memory_space<vmem>>, vector<256x256xbf16>
    %cst_28 = arith.constant dense<0.000000e+00> : vector<16x256xf32>
    %35 = tpu.matmul %33, %34, %cst_28 {dimension_numbers = #tpu.dot_dimension_numbers<[1], [0], [0], [1], [0, 0, 1, 1], [], []>} : vector<16x256xbf16>, vector<256x256xbf16>, vector<16x256xf32> -> vector<16x256xf32>
    %c0_29 = arith.constant 0 : index
    %c0_30 = arith.constant 0 : index
    %36 = vector.load %arg11[%c0_29, %c0_30] : memref<1x256xf32, #tpu.memory_space<vmem>>, vector<1x256xf32>
    %37 = vector.broadcast %36 : vector<1x256xf32> to vector<16x256xf32>
    %38 = arith.addf %35, %37 : vector<16x256xf32>
    %cst_31 = arith.constant 0.000000e+00 : f32
    %39 = vector.broadcast %cst_31 : f32 to vector<16x256xf32>
    %40 = arith.subf %39, %38 : vector<16x256xf32>
    %41 = math.exp %40 : vector<16x256xf32>
    %cst_32 = arith.constant 1.000000e+00 : f32
    %42 = vector.broadcast %cst_32 : f32 to vector<16x256xf32>
    %43 = arith.addf %42, %41 : vector<16x256xf32>
    %44 = tpu.reciprocal %43 {approx = true} : vector<16x256xf32> -> vector<16x256xf32>
    %45 = vector.extract_strided_slice %44 {offsets = [0, 0], sizes = [8, 256], strides = [1, 1]} : vector<16x256xf32> to vector<8x256xf32>
    %46 = arith.truncf %45 : vector<8x256xf32> to vector<8x256xbf16>
    %c0_33 = arith.constant 0 : index
    %c0_34 = arith.constant 0 : index
    %47 = vector.load %arg16[%c0_33, %c0_34] : memref<8x256xbf16, #tpu.memory_space<vmem>>, vector<8x256xbf16>
    tpu.vector_store %arg16[%c0_33, %c0_34], %46 {strides = array<i32>} : memref<8x256xbf16, #tpu.memory_space<vmem>>, vector<8x256xbf16>,
    %48 = vector.extract_strided_slice %44 {offsets = [8, 0], sizes = [8, 256], strides = [1, 1]} : vector<16x256xf32> to vector<8x256xf32>
    %49 = arith.truncf %48 : vector<8x256xf32> to vector<8x256xbf16>
    %c0_35 = arith.constant 0 : index
    %c0_36 = arith.constant 0 : index
    %50 = vector.load %arg19[%c0_35, %c0_36] : memref<8x256xbf16, #tpu.memory_space<vmem>>, vector<8x256xbf16>
    tpu.vector_store %arg19[%c0_35, %c0_36], %49 {strides = array<i32>} : memref<8x256xbf16, #tpu.memory_space<vmem>>, vector<8x256xbf16>,
    %c0_37 = arith.constant 0 : index
    %c0_38 = arith.constant 0 : index
    %51 = vector.load %arg1[%c0_37, %c0_38] : memref<8x128xf32, #tpu.memory_space<vmem>>, vector<8x128xf32>
    %52 = tpu.concatenate %51, %0 in 0 : vector<8x128xf32>, vector<8x128xf32> -> vector<16x128xf32>
    %53 = arith.truncf %52 : vector<16x128xf32> to vector<16x128xbf16>
    %c1 = arith.constant 1 : index
    %c0_39 = arith.constant 0 : index
    %c0_40 = arith.constant 0 : index
    %54 = vector.load %arg4[%c1, %c0_39, %c0_40] : memref<3x128x128xbf16, #tpu.memory_space<vmem>>, vector<1x128x128xbf16>
    %55 = vector.shape_cast %54 : vector<1x128x128xbf16> to vector<128x128xbf16>
    %cst_41 = arith.constant dense<0.000000e+00> : vector<16x128xf32>
    %56 = tpu.matmul %53, %55, %cst_41 {dimension_numbers = #tpu.dot_dimension_numbers<[1], [0], [0], [1], [0, 0, 1, 1], [], []>} : vector<16x128xbf16>, vector<128x128xbf16>, vector<16x128xf32> -> vector<16x128xf32>
    %c1_42 = arith.constant 1 : index
    %c0_43 = arith.constant 0 : index
    %c0_44 = arith.constant 0 : index
    %57 = vector.load %arg5[%c1_42, %c0_43, %c0_44] : memref<3x1x128xf32, #tpu.memory_space<vmem>>, vector<1x1x128xf32>
    %58 = vector.shape_cast %57 : vector<1x1x128xf32> to vector<1x128xf32>
    %59 = vector.broadcast %58 : vector<1x128xf32> to vector<16x128xf32>
    %60 = arith.addf %56, %59 : vector<16x128xf32>
    %cst_45 = arith.constant 0.000000e+00 : f32
    %61 = vector.broadcast %cst_45 : f32 to vector<16x128xf32>
    %62 = arith.maximumf %60, %61 : vector<16x128xf32>
    %63 = arith.truncf %62 : vector<16x128xf32> to vector<16x128xbf16>
    %c1_46 = arith.constant 1 : index
    %c0_47 = arith.constant 0 : index
    %c0_48 = arith.constant 0 : index
    %64 = vector.load %arg6[%c1_46, %c0_47, %c0_48] : memref<3x128x128xbf16, #tpu.memory_space<vmem>>, vector<1x128x128xbf16>
    %65 = vector.shape_cast %64 : vector<1x128x128xbf16> to vector<128x128xbf16>
    %cst_49 = arith.constant dense<0.000000e+00> : vector<16x128xf32>
    %66 = tpu.matmul %63, %65, %cst_49 {dimension_numbers = #tpu.dot_dimension_numbers<[1], [0], [0], [1], [0, 0, 1, 1], [], []>} : vector<16x128xbf16>, vector<128x128xbf16>, vector<16x128xf32> -> vector<16x128xf32>
    %c1_50 = arith.constant 1 : index
    %c0_51 = arith.constant 0 : index
    %c0_52 = arith.constant 0 : index
    %67 = vector.load %arg7[%c1_50, %c0_51, %c0_52] : memref<3x1x128xf32, #tpu.memory_space<vmem>>, vector<1x1x128xf32>
    %68 = vector.shape_cast %67 : vector<1x1x128xf32> to vector<1x128xf32>
    %69 = vector.broadcast %68 : vector<1x128xf32> to vector<16x128xf32>
    %70 = arith.addf %66, %69 : vector<16x128xf32>
    %cst_53 = arith.constant 0.000000e+00 : f32
    %71 = vector.broadcast %cst_53 : f32 to vector<16x128xf32>
    %72 = arith.maximumf %70, %71 : vector<16x128xf32>
    %73 = arith.truncf %72 : vector<16x128xf32> to vector<16x128xbf16>
    %c1_54 = arith.constant 1 : index
    %c0_55 = arith.constant 0 : index
    %c0_56 = arith.constant 0 : index
    %74 = vector.load %arg8[%c1_54, %c0_55, %c0_56] : memref<3x128x256xbf16, #tpu.memory_space<vmem>>, vector<1x128x256xbf16>
    %75 = vector.shape_cast %74 : vector<1x128x256xbf16> to vector<128x256xbf16>
    %cst_57 = arith.constant dense<0.000000e+00> : vector<16x256xf32>
    %76 = tpu.matmul %73, %75, %cst_57 {dimension_numbers = #tpu.dot_dimension_numbers<[1], [0], [0], [1], [0, 0, 1, 1], [], []>} : vector<16x128xbf16>, vector<128x256xbf16>, vector<16x256xf32> -> vector<16x256xf32>
    %c1_58 = arith.constant 1 : index
    %c0_59 = arith.constant 0 : index
    %c0_60 = arith.constant 0 : index
    %77 = vector.load %arg9[%c1_58, %c0_59, %c0_60] : memref<3x1x256xf32, #tpu.memory_space<vmem>>, vector<1x1x256xf32>
    %78 = vector.shape_cast %77 : vector<1x1x256xf32> to vector<1x256xf32>
    %79 = vector.broadcast %78 : vector<1x256xf32> to vector<16x256xf32>
    %80 = arith.addf %76, %79 : vector<16x256xf32>
    %cst_61 = arith.constant 0.000000e+00 : f32
    %81 = vector.broadcast %cst_61 : f32 to vector<16x256xf32>
    %82 = arith.maximumf %80, %81 : vector<16x256xf32>
    %83 = arith.truncf %82 : vector<16x256xf32> to vector<16x256xbf16>
    %c0_62 = arith.constant 0 : index
    %c0_63 = arith.constant 0 : index
    %84 = vector.load %arg12[%c0_62, %c0_63] : memref<256x128xbf16, #tpu.memory_space<vmem>>, vector<256x128xbf16>
    %cst_64 = arith.constant dense<0.000000e+00> : vector<16x128xf32>
    %85 = tpu.matmul %83, %84, %cst_64 {dimension_numbers = #tpu.dot_dimension_numbers<[1], [0], [0], [1], [0, 0, 1, 1], [], []>} : vector<16x256xbf16>, vector<256x128xbf16>, vector<16x128xf32> -> vector<16x128xf32>
    %c0_65 = arith.constant 0 : index
    %c0_66 = arith.constant 0 : index
    %86 = vector.load %arg13[%c0_65, %c0_66] : memref<1x128xf32, #tpu.memory_space<vmem>>, vector<1x128xf32>
    %87 = vector.broadcast %86 : vector<1x128xf32> to vector<16x128xf32>
    %88 = arith.addf %85, %87 : vector<16x128xf32>
    %cst_67 = arith.constant 0.000000e+00 : f32
    %89 = vector.broadcast %cst_67 : f32 to vector<16x128xf32>
    %90 = arith.subf %89, %88 : vector<16x128xf32>
    %91 = math.exp %90 : vector<16x128xf32>
    %cst_68 = arith.constant 1.000000e+00 : f32
    %92 = vector.broadcast %cst_68 : f32 to vector<16x128xf32>
    %93 = arith.addf %92, %91 : vector<16x128xf32>
    %94 = tpu.reciprocal %93 {approx = true} : vector<16x128xf32> -> vector<16x128xf32>
    %95 = vector.extract_strided_slice %94 {offsets = [0, 0], sizes = [8, 128], strides = [1, 1]} : vector<16x128xf32> to vector<8x128xf32>
    %96 = arith.truncf %95 : vector<8x128xf32> to vector<8x128xbf16>
    %c0_69 = arith.constant 0 : index
    %c0_70 = arith.constant 0 : index
    %97 = vector.load %arg17[%c0_69, %c0_70] : memref<8x128xbf16, #tpu.memory_space<vmem>>, vector<8x128xbf16>
    tpu.vector_store %arg17[%c0_69, %c0_70], %96 {strides = array<i32>} : memref<8x128xbf16, #tpu.memory_space<vmem>>, vector<8x128xbf16>,
    %98 = vector.extract_strided_slice %94 {offsets = [8, 0], sizes = [8, 128], strides = [1, 1]} : vector<16x128xf32> to vector<8x128xf32>
    %99 = arith.truncf %98 : vector<8x128xf32> to vector<8x128xbf16>
    %c0_71 = arith.constant 0 : index
    %c0_72 = arith.constant 0 : index
    %100 = vector.load %arg20[%c0_71, %c0_72] : memref<8x128xbf16, #tpu.memory_space<vmem>>, vector<8x128xbf16>
    tpu.vector_store %arg20[%c0_71, %c0_72], %99 {strides = array<i32>} : memref<8x128xbf16, #tpu.memory_space<vmem>>, vector<8x128xbf16>,
    %c0_73 = arith.constant 0 : index
    %c0_74 = arith.constant 0 : index
    %101 = vector.load %arg2[%c0_73, %c0_74] : memref<8x128xf32, #tpu.memory_space<vmem>>, vector<8x128xf32>
    %102 = tpu.concatenate %101, %0 in 0 : vector<8x128xf32>, vector<8x128xf32> -> vector<16x128xf32>
    %103 = arith.truncf %102 : vector<16x128xf32> to vector<16x128xbf16>
    %c2 = arith.constant 2 : index
    %c0_75 = arith.constant 0 : index
    %c0_76 = arith.constant 0 : index
    %104 = vector.load %arg4[%c2, %c0_75, %c0_76] : memref<3x128x128xbf16, #tpu.memory_space<vmem>>, vector<1x128x128xbf16>
    %105 = vector.shape_cast %104 : vector<1x128x128xbf16> to vector<128x128xbf16>
    %cst_77 = arith.constant dense<0.000000e+00> : vector<16x128xf32>
    %106 = tpu.matmul %103, %105, %cst_77 {dimension_numbers = #tpu.dot_dimension_numbers<[1], [0], [0], [1], [0, 0, 1, 1], [], []>} : vector<16x128xbf16>, vector<128x128xbf16>, vector<16x128xf32> -> vector<16x128xf32>
    %c2_78 = arith.constant 2 : index
    %c0_79 = arith.constant 0 : index
    %c0_80 = arith.constant 0 : index
    %107 = vector.load %arg5[%c2_78, %c0_79, %c0_80] : memref<3x1x128xf32, #tpu.memory_space<vmem>>, vector<1x1x128xf32>
    %108 = vector.shape_cast %107 : vector<1x1x128xf32> to vector<1x128xf32>
    %109 = vector.broadcast %108 : vector<1x128xf32> to vector<16x128xf32>
    %110 = arith.addf %106, %109 : vector<16x128xf32>
    %cst_81 = arith.constant 0.000000e+00 : f32
    %111 = vector.broadcast %cst_81 : f32 to vector<16x128xf32>
    %112 = arith.maximumf %110, %111 : vector<16x128xf32>
    %113 = arith.truncf %112 : vector<16x128xf32> to vector<16x128xbf16>
    %c2_82 = arith.constant 2 : index
    %c0_83 = arith.constant 0 : index
    %c0_84 = arith.constant 0 : index
    %114 = vector.load %arg6[%c2_82, %c0_83, %c0_84] : memref<3x128x128xbf16, #tpu.memory_space<vmem>>, vector<1x128x128xbf16>
    %115 = vector.shape_cast %114 : vector<1x128x128xbf16> to vector<128x128xbf16>
    %cst_85 = arith.constant dense<0.000000e+00> : vector<16x128xf32>
    %116 = tpu.matmul %113, %115, %cst_85 {dimension_numbers = #tpu.dot_dimension_numbers<[1], [0], [0], [1], [0, 0, 1, 1], [], []>} : vector<16x128xbf16>, vector<128x128xbf16>, vector<16x128xf32> -> vector<16x128xf32>
    %c2_86 = arith.constant 2 : index
    %c0_87 = arith.constant 0 : index
    %c0_88 = arith.constant 0 : index
    %117 = vector.load %arg7[%c2_86, %c0_87, %c0_88] : memref<3x1x128xf32, #tpu.memory_space<vmem>>, vector<1x1x128xf32>
    %118 = vector.shape_cast %117 : vector<1x1x128xf32> to vector<1x128xf32>
    %119 = vector.broadcast %118 : vector<1x128xf32> to vector<16x128xf32>
    %120 = arith.addf %116, %119 : vector<16x128xf32>
    %cst_89 = arith.constant 0.000000e+00 : f32
    %121 = vector.broadcast %cst_89 : f32 to vector<16x128xf32>
    %122 = arith.maximumf %120, %121 : vector<16x128xf32>
    %123 = arith.truncf %122 : vector<16x128xf32> to vector<16x128xbf16>
    %c2_90 = arith.constant 2 : index
    %c0_91 = arith.constant 0 : index
    %c0_92 = arith.constant 0 : index
    %124 = vector.load %arg8[%c2_90, %c0_91, %c0_92] : memref<3x128x256xbf16, #tpu.memory_space<vmem>>, vector<1x128x256xbf16>
    %125 = vector.shape_cast %124 : vector<1x128x256xbf16> to vector<128x256xbf16>
    %cst_93 = arith.constant dense<0.000000e+00> : vector<16x256xf32>
    %126 = tpu.matmul %123, %125, %cst_93 {dimension_numbers = #tpu.dot_dimension_numbers<[1], [0], [0], [1], [0, 0, 1, 1], [], []>} : vector<16x128xbf16>, vector<128x256xbf16>, vector<16x256xf32> -> vector<16x256xf32>
    %c2_94 = arith.constant 2 : index
    %c0_95 = arith.constant 0 : index
    %c0_96 = arith.constant 0 : index
    %127 = vector.load %arg9[%c2_94, %c0_95, %c0_96] : memref<3x1x256xf32, #tpu.memory_space<vmem>>, vector<1x1x256xf32>
    %128 = vector.shape_cast %127 : vector<1x1x256xf32> to vector<1x256xf32>
    %129 = vector.broadcast %128 : vector<1x256xf32> to vector<16x256xf32>
    %130 = arith.addf %126, %129 : vector<16x256xf32>
    %cst_97 = arith.constant 0.000000e+00 : f32
    %131 = vector.broadcast %cst_97 : f32 to vector<16x256xf32>
    %132 = arith.maximumf %130, %131 : vector<16x256xf32>
    %133 = arith.truncf %132 : vector<16x256xf32> to vector<16x256xbf16>
    %c0_98 = arith.constant 0 : index
    %c0_99 = arith.constant 0 : index
    %134 = vector.load %arg14[%c0_98, %c0_99] : memref<256x384xbf16, #tpu.memory_space<vmem>>, vector<256x384xbf16>
    %cst_100 = arith.constant dense<0.000000e+00> : vector<16x384xf32>
    %135 = tpu.matmul %133, %134, %cst_100 {dimension_numbers = #tpu.dot_dimension_numbers<[1], [0], [0], [1], [0, 0, 1, 1], [], []>} : vector<16x256xbf16>, vector<256x384xbf16>, vector<16x384xf32> -> vector<16x384xf32>
    %c0_101 = arith.constant 0 : index
    %c0_102 = arith.constant 0 : index
    %136 = vector.load %arg15[%c0_101, %c0_102] : memref<1x384xf32, #tpu.memory_space<vmem>>, vector<1x384xf32>
    %137 = vector.broadcast %136 : vector<1x384xf32> to vector<16x384xf32>
    %138 = arith.addf %135, %137 : vector<16x384xf32>
    %cst_103 = arith.constant 0.000000e+00 : f32
    %139 = vector.broadcast %cst_103 : f32 to vector<16x384xf32>
    %140 = arith.subf %139, %138 : vector<16x384xf32>
    %141 = math.exp %140 : vector<16x384xf32>
    %cst_104 = arith.constant 1.000000e+00 : f32
    %142 = vector.broadcast %cst_104 : f32 to vector<16x384xf32>
    %143 = arith.addf %142, %141 : vector<16x384xf32>
    %144 = tpu.reciprocal %143 {approx = true} : vector<16x384xf32> -> vector<16x384xf32>
    %145 = vector.extract_strided_slice %144 {offsets = [0, 0], sizes = [8, 384], strides = [1, 1]} : vector<16x384xf32> to vector<8x384xf32>
    %146 = arith.truncf %145 : vector<8x384xf32> to vector<8x384xbf16>
    %c0_105 = arith.constant 0 : index
    %c0_106 = arith.constant 0 : index
    %147 = vector.load %arg18[%c0_105, %c0_106] : memref<8x384xbf16, #tpu.memory_space<vmem>>, vector<8x384xbf16>
    tpu.vector_store %arg18[%c0_105, %c0_106], %146 {strides = array<i32>} : memref<8x384xbf16, #tpu.memory_space<vmem>>, vector<8x384xbf16>,
    %148 = vector.extract_strided_slice %144 {offsets = [8, 0], sizes = [8, 384], strides = [1, 1]} : vector<16x384xf32> to vector<8x384xf32>
    %149 = arith.truncf %148 : vector<8x384xf32> to vector<8x384xbf16>
    %c0_107 = arith.constant 0 : index
    %c0_108 = arith.constant 0 : index
    %150 = vector.load %arg21[%c0_107, %c0_108] : memref<8x384xbf16, #tpu.memory_space<vmem>>, vector<8x384xbf16>
    tpu.vector_store %arg21[%c0_107, %c0_108], %149 {strides = array<i32>} : memref<8x384xbf16, #tpu.memory_space<vmem>>, vector<8x384xbf16>,
    return
  }
}

</mosaic_0001>

<bundles_post_ra>
// kernel: decoder_cada_forward.1
= control target key start
LH: loop header
LB: loop body
LE: loop exit
PB: predicated region body
PF: predicated region fallthrough
CT: control target
= control target key end

     0   :  { %s3801_s0 = inlined_call_operand.hbm [shape: f32[8,128], index: 0, kind: input, shape index: {}]   ;;  %s3802_s1 = inlined_call_operand.hbm [shape: f32[8,128], index: 1, kind: input, shape index: {}]   ;;  %s3803_s2 = inlined_call_operand.hbm [shape: f32[8,128], index: 2, kind: input, shape index: {}]   ;;  %s3804_s3 = inlined_call_operand.vmem [shape: f32[8,128], index: 3, kind: input, shape index: {}]   ;;  %s3805_s4 = inlined_call_operand.hbm [shape: bf16[3,128,128], index: 4, kind: input, shape index: {}]   ;;  %s3806_s5 = inlined_call_operand.vmem [shape: f32[3,1,128], index: 5, kind: input, shape index: {}]   ;;  %s3807_s6 = inlined_call_operand.hbm [shape: bf16[3,128,128], index: 6, kind: input, shape index: {}]   ;;  %s3808_s7 = inlined_call_operand.vmem [shape: f32[3,1,128], index: 7, kind: input, shape index: {}]   ;;  %s3809_s8 = inlined_call_operand.hbm [shape: bf16[3,128,256], index: 8, kind: input, shape index: {}]   ;;  %s3810_s9 = inlined_call_operand.vmem [shape: f32[3,1,256], index: 9, kind: input, shape index: {}]   ;;  %s3811_s10 = inlined_call_operand.hbm [shape: bf16[256,256], index: 10, kind: input, shape index: {}]   ;;  %s3812_s11 = inlined_call_operand.vmem [shape: f32[1,256], index: 11, kind: input, shape index: {}]   ;;  %s3813_s12 = inlined_call_operand.hbm [shape: bf16[256,128], index: 12, kind: input, shape index: {}]   ;;  %s3814_s13 = inlined_call_operand.hbm [shape: f32[1,128], index: 13, kind: input, shape index: {}]   ;;  %s3815_s14 = inlined_call_operand.hbm [shape: bf16[256,384], index: 14, kind: input, shape index: {}]   ;;  %s3816_s15 = inlined_call_operand.hbm [shape: f32[1,384], index: 15, kind: input, shape index: {}]   ;;  %s3817_s16 = inlined_call_operand.vmem [shape: bf16[8,256], index: 16, kind: output, shape index: {0}]   ;;  %s3818_s17 = inlined_call_operand.vmem [shape: bf16[8,128], index: 17, kind: output, shape index: {1}]   ;;  %s3819_s18 = inlined_call_operand.vmem [shape: bf16[8,384], index: 18, kind: output, shape index: {2}]   ;;  %s3820_s19 = inlined_call_operand.vmem [shape: bf16[8,256], index: 19, kind: output, shape index: {3}]   ;;  %s3821_s20 = inlined_call_operand.vmem [shape: bf16[8,128], index: 20, kind: output, shape index: {4}]   ;;  %s3822_s21 = inlined_call_operand.vmem [shape: bf16[8,384], index: 21, kind: output, shape index: {5}]  }
   0x1   :  { %3837 = sst [smem:[#allocation25_spill]] %s3801_s0 }
   0x2   :  { %3838 = sst [smem:[#allocation26_spill]] %s3802_s1 }
   0x3   :  { %3839 = sst [smem:[#allocation27_spill]] %s3803_s2 }
   0x4   :  { %3840 = sst [smem:[#allocation28_spill]] %s3804_s3 }
   0x5   :  { %3841 = sst [smem:[#allocation29_spill]] %s3805_s4 }
   0x6   :  { %3842 = sst [smem:[#allocation30_spill]] %s3806_s5 }
   0x7   :  { %3843 = sst [smem:[#allocation31_spill]] %s3819_s18 }
   0x8   :  { %3844 = sst [smem:[#allocation32_spill]] %s3822_s21 }
   0x9   :  { %27 = vsyncpa [#allocation3], 0 }
   0xa   :  { %28 = vsyncpa [#allocation5], 0 }
   0xb   :  { %29 = vsyncpa [#allocation8], 0 }
   0xc   :  { %30 = vsyncpa [#allocation11], 0 }
   0xd   :  { %31 = vsyncpa [#allocation14], 0 }
   0xe   :  { %32 = vsyncpa [#allocation17], 0  ;;  %s3371_s2 = smov [#allocation4]   ;;  %s3372_s26 = smov [#allocation7]  }
   0xf   :  { %s49_s25 = sshll.u32 %s3371_s2, 4  ;;  %s70_s27 = sshll.u32 %s3372_s26, 4  ;;  %s50_s25 = int_to_ptr.vmem [resolvable:$true] %s49_s25  ;;  %s3501_s27 = int_to_ptr.vmem [resolvable:$true] %s70_s27 }
  0x10   :  { %s3845_s29 = sld [smem:[#allocation26_spill]] }
  0x16   :  { %s3117_s0 = scalar_lea.hbm %s3845_s29, 128 }
  0x17   :  { %p3118_p0 = scmp.ne.s32.totalorder %s3845_s29, %s3117_s0  ;;  %p3121_p1 = scmp.lt.u32.totalorder %s3117_s0, %s3845_s29 }
  0x19   :  { %p3123_p2 = pnand %p3121_p1, %p3118_p0 }
  0x1b   :  { %3126 = shalt.err (!%p3123_p2)
}
  0x1c   :  { %s3127_s23 = scalar_lea.vmem %s50_s25, 128  ;;  %p3132_p4 = scmp.lt.s32.totalorder %s50_s25, %s50_s25 }
  0x1d   :  { %p3128_p3 = scmp.ne.s32.totalorder %s50_s25, %s3127_s23  ;;  %p3133_p5 = scmp.lt.s32.totalorder %s3127_s23, %s3127_s23 }
  0x1f   :  { %p3134_p6 = por %p3133_p5, %p3132_p4 }
  0x21   :  { %p3135_p7 = pnand %p3134_p6, %p3128_p3 }
  0x23   :  { %3138 = shalt.err (!%p3135_p7)
}
  0x24   :  { %52 = dma.hbm_to_vmem [thread:$0]  %s3845_s29, 128, %s50_s25, [#allocation5]  }
  0x25   :  { %s3846_s3 = sld [smem:[#allocation29_spill]] }
  0x2b   :  { %s3139_s28 = scalar_lea.hbm %s3846_s3, 3072 }
  0x2c   :  { %p3140_p8 = scmp.ne.s32.totalorder %s3846_s3, %s3139_s28  ;;  %p3143_p9 = scmp.lt.u32.totalorder %s3139_s28, %s3846_s3 }
  0x2e   :  { %p3145_p10 = pnand %p3143_p9, %p3140_p8 }
  0x30   :  { %3148 = shalt.err (!%p3145_p10)
}
  0x31   :  { %s3149_s22 = scalar_lea.vmem %s3501_s27, 3072  ;;  %p3154_p12 = scmp.lt.s32.totalorder %s3501_s27, %s3501_s27 }
  0x32   :  { %p3150_p11 = scmp.ne.s32.totalorder %s3501_s27, %s3149_s22  ;;  %p3155_p13 = scmp.lt.s32.totalorder %s3149_s22, %s3149_s22 }
  0x34   :  { %p3156_p0 = por %p3155_p13, %p3154_p12 }
  0x36   :  { %p3157_p1 = pnand %p3156_p0, %p3150_p11 }
  0x38   :  { %3160 = shalt.err (!%p3157_p1)
}
  0x39   :  { %s3830_s25 = smov 64   ;;  %s3832_s29 = smov 4  }
  0x3a   :  { %76 = dma.hbm_to_vmem [thread:$0]  %s3846_s3, 3072, %s3501_s27, [#allocation8], %s3830_s25, %s3830_s25, %s3832_s29  }
  0x3b   :  { %s3375_s24 = smov [#allocation10]   ;;  %s3161_s4 = scalar_lea.hbm %s3809_s8, 6144 }
  0x3c   :  { %s98_s2 = sshll.u32 %s3375_s24, 4  ;;  %p3162_p2 = scmp.ne.s32.totalorder %s3809_s8, %s3161_s4  ;;  %s99_s2 = int_to_ptr.vmem [resolvable:$true] %s98_s2 }
  0x3d   :  { %p3165_p3 = scmp.lt.u32.totalorder %s3161_s4, %s3809_s8 }
  0x3f   :  { %p3167_p4 = pnand %p3165_p3, %p3162_p2 }
  0x41   :  { %3170 = shalt.err (!%p3167_p4)
}
  0x42   :  { %s3171_s21 = scalar_lea.vmem %s99_s2, 6144  ;;  %p3176_p6 = scmp.lt.s32.totalorder %s99_s2, %s99_s2 }
  0x43   :  { %p3172_p5 = scmp.ne.s32.totalorder %s99_s2, %s3171_s21  ;;  %p3177_p7 = scmp.lt.s32.totalorder %s3171_s21, %s3171_s21 }
  0x45   :  { %p3178_p8 = por %p3177_p7, %p3176_p6 }
  0x47   :  { %p3179_p9 = pnand %p3178_p8, %p3172_p5 }
  0x49   :  { %3182 = shalt.err (!%p3179_p9)
}
  0x4a   :  { %s3834_s27 = smov 128   ;;  %s3835_s3 = smov 8  }
  0x4b   :  { %104 = dma.hbm_to_vmem [thread:$0]  %s3809_s8, 6144, %s99_s2, [#allocation11], %s3834_s27, %s3834_s27, %s3835_s3  }
  0x4c   :  { %s3378_s24 = smov [#allocation13]   ;;  %s3379_s28 = smov [#allocation16]  }
  0x4d   :  { %s126_s26 = sshll.u32 %s3378_s24, 4  ;;  %s148_s4 = sshll.u32 %s3379_s28, 4  ;;  %s127_s26 = int_to_ptr.vmem [resolvable:$true] %s126_s26  ;;  %s149_s4 = int_to_ptr.vmem [resolvable:$true] %s148_s4 }
  0x4e   :  { %s3183_s21 = scalar_lea.hbm %s3813_s12, 2048 }
  0x4f   :  { %p3184_p10 = scmp.ne.s32.totalorder %s3813_s12, %s3183_s21  ;;  %p3187_p11 = scmp.lt.u32.totalorder %s3183_s21, %s3813_s12 }
  0x51   :  { %p3189_p12 = pnand %p3187_p11, %p3184_p10 }
  0x53   :  { %3192 = shalt.err (!%p3189_p12)
}
  0x54   :  { %s3193_s8 = scalar_lea.vmem %s127_s26, 2048  ;;  %p3198_p0 = scmp.lt.s32.totalorder %s127_s26, %s127_s26 }
  0x55   :  { %p3194_p13 = scmp.ne.s32.totalorder %s127_s26, %s3193_s8  ;;  %p3199_p1 = scmp.lt.s32.totalorder %s3193_s8, %s3193_s8 }
  0x57   :  { %p3200_p2 = por %p3199_p1, %p3198_p0 }
  0x59   :  { %p3201_p3 = pnand %p3200_p2, %p3194_p13 }
  0x5b   :  { %3204 = shalt.err (!%p3201_p3)
}
  0x5c   :  { %s3847_s2 = smov 4   ;;  %s3848_s23 = smov 64  }
  0x5d   :  { %132 = dma.hbm_to_vmem [thread:$0]  %s3813_s12, 2048, %s127_s26, [#allocation14], %s3848_s23, %s3848_s23, %s3847_s2  }
  0x5e   :  { %s3205_s29 = scalar_lea.hbm %s3815_s14, 6144 }
  0x5f   :  { %p3206_p4 = scmp.ne.s32.totalorder %s3815_s14, %s3205_s29  ;;  %p3209_p5 = scmp.lt.u32.totalorder %s3205_s29, %s3815_s14 }
  0x61   :  { %p3211_p6 = pnand %p3209_p5, %p3206_p4 }
  0x63   :  { %3214 = shalt.err (!%p3211_p6)
}
  0x64   :  { %s3215_s22 = scalar_lea.vmem %s149_s4, 6144  ;;  %p3220_p8 = scmp.lt.s32.totalorder %s149_s4, %s149_s4 }
  0x65   :  { %p3216_p7 = scmp.ne.s32.totalorder %s149_s4, %s3215_s22  ;;  %p3221_p9 = scmp.lt.s32.totalorder %s3215_s22, %s3215_s22 }
  0x67   :  { %p3222_p10 = por %p3221_p9, %p3220_p8 }
  0x69   :  { %p3223_p11 = pnand %p3222_p10, %p3216_p7 }
  0x6b   :  { %3226 = shalt.err (!%p3223_p11)
}
  0x6c   :  { %s3380_s12 = smov 192   ;;  %s3381_s26 = smov 12  }
  0x6d   :  { %154 = dma.hbm_to_vmem [thread:$0]  %s3815_s14, 6144, %s149_s4, [#allocation17], %s3380_s12, %s3380_s12, %s3381_s26  }
  0x6e   :  { %s3382_s24 = smov [#allocation2]   ;;  %s3383_s25 = smov [#allocation6]  }
  0x6f   :  { %s39_s28 = sshll.u32 %s3382_s24, 4  ;;  %s59_s29 = sshll.u32 %s3383_s25, 4  ;;  %s40_s28 = int_to_ptr.vmem [resolvable:$true] %s39_s28  ;;  %s60_s29 = int_to_ptr.vmem [resolvable:$true] %s59_s29 }
  0x70   :  { %s3849_s21 = sld [smem:[#allocation25_spill]] }
  0x76   :  { %s3227_s5 = scalar_lea.hbm %s3849_s21, 128 }
  0x77   :  { %p3228_p12 = scmp.ne.s32.totalorder %s3849_s21, %s3227_s5  ;;  %p3231_p13 = scmp.lt.u32.totalorder %s3227_s5, %s3849_s21 }
  0x79   :  { %p3233_p0 = pnand %p3231_p13, %p3228_p12 }
  0x7b   :  { %3236 = shalt.err (!%p3233_p0)
}
  0x7c   :  { %s3237_s14 = scalar_lea.vmem %s40_s28, 128  ;;  %p3242_p2 = scmp.lt.s32.totalorder %s40_s28, %s40_s28 }
  0x7d   :  { %p3238_p1 = scmp.ne.s32.totalorder %s40_s28, %s3237_s14  ;;  %p3243_p3 = scmp.lt.s32.totalorder %s3237_s14, %s3237_s14 }
  0x7f   :  { %p3244_p4 = por %p3243_p3, %p3242_p2 }
  0x81   :  { %p3245_p5 = pnand %p3244_p4, %p3238_p1 }
  0x83   :  { %3248 = shalt.err (!%p3245_p5)
}
  0x84   :  { %42 = dma.hbm_to_vmem [thread:$0]  %s3849_s21, 128, %s40_s28, [#allocation3]  }
  0x85   :  { %s3850_s8 = sld [smem:[#allocation27_spill]] }
  0x8b   :  { %s3249_s1 = scalar_lea.hbm %s3850_s8, 128 }
  0x8c   :  { %p3250_p6 = scmp.ne.s32.totalorder %s3850_s8, %s3249_s1  ;;  %p3253_p7 = scmp.lt.u32.totalorder %s3249_s1, %s3850_s8 }
  0x8e   :  { %p3255_p8 = pnand %p3253_p7, %p3250_p6 }
  0x90   :  { %3258 = shalt.err (!%p3255_p8)
}
  0x91   :  { %s3259_s30 = scalar_lea.vmem %s60_s29, 128  ;;  %p3264_p10 = scmp.lt.s32.totalorder %s60_s29, %s60_s29 }
  0x92   :  { %p3260_p9 = scmp.ne.s32.totalorder %s60_s29, %s3259_s30  ;;  %p3265_p11 = scmp.lt.s32.totalorder %s3259_s30, %s3259_s30 }
  0x94   :  { %p3266_p12 = por %p3265_p11, %p3264_p10 }
  0x96   :  { %p3267_p13 = pnand %p3266_p12, %p3260_p9 }
  0x98   :  { %3270 = shalt.err (!%p3267_p13)
}
  0x99   :  { %62 = dma.hbm_to_vmem [thread:$0]  %s3850_s8, 128, %s60_s29, [#allocation5]  }
  0x9a   :  { %s3384_s21 = smov [#allocation9]   ;;  %s3385_s22 = smov [#allocation12]  }
  0x9b   :  { %s84_s5 = sshll.u32 %s3384_s21, 4  ;;  %s112_s14 = sshll.u32 %s3385_s22, 4  ;;  %s85_s5 = int_to_ptr.vmem [resolvable:$true] %s84_s5  ;;  %s113_s14 = int_to_ptr.vmem [resolvable:$true] %s112_s14 }
  0x9c   :  { %s3271_s27 = scalar_lea.hbm %s3807_s6, 3072 }
  0x9d   :  { %p3272_p0 = scmp.ne.s32.totalorder %s3807_s6, %s3271_s27  ;;  %p3275_p1 = scmp.lt.u32.totalorder %s3271_s27, %s3807_s6 }
  0x9f   :  { %p3277_p2 = pnand %p3275_p1, %p3272_p0 }
  0xa1   :  { %3280 = shalt.err (!%p3277_p2)
}
  0xa2   :  { %s3281_s29 = scalar_lea.vmem %s85_s5, 3072  ;;  %p3286_p4 = scmp.lt.s32.totalorder %s85_s5, %s85_s5 }
  0xa3   :  { %p3282_p3 = scmp.ne.s32.totalorder %s85_s5, %s3281_s29  ;;  %p3287_p5 = scmp.lt.s32.totalorder %s3281_s29, %s3281_s29 }
  0xa5   :  { %p3288_p6 = por %p3287_p5, %p3286_p4 }
  0xa7   :  { %p3289_p7 = pnand %p3288_p6, %p3282_p3 }
  0xa9   :  { %3292 = shalt.err (!%p3289_p7)
}
  0xaa   :  { %90 = dma.hbm_to_vmem [thread:$0]  %s3807_s6, 3072, %s85_s5, [#allocation8], %s3848_s23, %s3848_s23, %s3847_s2  }
  0xab   :  { %s3293_s28 = scalar_lea.hbm %s3811_s10, 4096 }
  0xac   :  { %p3294_p8 = scmp.ne.s32.totalorder %s3811_s10, %s3293_s28  ;;  %p3297_p9 = scmp.lt.u32.totalorder %s3293_s28, %s3811_s10 }
  0xae   :  { %p3299_p10 = pnand %p3297_p9, %p3294_p8 }
  0xb0   :  { %3302 = shalt.err (!%p3299_p10)
}
  0xb1   :  { %s3303_s12 = scalar_lea.vmem %s113_s14, 4096  ;;  %p3308_p12 = scmp.lt.s32.totalorder %s113_s14, %s113_s14 }
  0xb2   :  { %p3304_p11 = scmp.ne.s32.totalorder %s113_s14, %s3303_s12  ;;  %p3309_p13 = scmp.lt.s32.totalorder %s3303_s12, %s3303_s12 }
  0xb4   :  { %p3310_p0 = por %p3309_p13, %p3308_p12 }
  0xb6   :  { %p3311_p1 = pnand %p3310_p0, %p3304_p11 }
  0xb8   :  { %3314 = shalt.err (!%p3311_p1)
}
  0xb9   :  { %s3851_s6 = smov 8   ;;  %s3852_s2 = smov 128  }
  0xba   :  { %118 = dma.hbm_to_vmem [thread:$0]  %s3811_s10, 4096, %s113_s14, [#allocation11], %s3852_s2, %s3852_s2, %s3851_s6  }
  0xbb   :  { %s3386_s27 = smov [#allocation15]   ;;  %s3387_s1 = smov [#allocation18]  }
  0xbc   :  { %s139_s26 = sshll.u32 %s3386_s27, 4  ;;  %s161_s18 = sshll.u32 %s3387_s1, 4  ;;  %s140_s26 = int_to_ptr.vmem [resolvable:$true] %s139_s26  ;;  %s162_s18 = int_to_ptr.vmem [resolvable:$true] %s161_s18 }
  0xbd   :  { %s3315_s8 = scalar_lea.hbm %s3814_s13, 16 }
  0xbe   :  { %p3316_p2 = scmp.ne.s32.totalorder %s3814_s13, %s3315_s8  ;;  %p3319_p3 = scmp.lt.u32.totalorder %s3315_s8, %s3814_s13 }
  0xc0   :  { %p3321_p4 = pnand %p3319_p3, %p3316_p2 }
  0xc2   :  { %3324 = shalt.err (!%p3321_p4)
}
  0xc3   :  { %s3325_s10 = scalar_lea.vmem %s140_s26, 16  ;;  %s3329_s14 = scalar_lea.vmem %s140_s26, 32 }
  0xc4   :  { %p3326_p5 = scmp.ne.s32.totalorder %s140_s26, %s3325_s10  ;;  %p3330_p6 = scmp.lt.s32.totalorder %s140_s26, %s140_s26 }
  0xc5   :  { %p3331_p7 = scmp.lt.s32.totalorder %s3329_s14, %s3325_s10 }
  0xc7   :  { %p3332_p8 = por %p3331_p7, %p3330_p6 }
  0xc9   :  { %p3333_p9 = pnand %p3332_p8, %p3326_p5 }
  0xcb   :  { %3336 = shalt.err (!%p3333_p9)
}
  0xcc   :  { %142 = dma.hbm_to_vmem [thread:$0]  %s3814_s13, 16, %s140_s26, [#allocation14]  }
  0xcd   :  { %s3337_s12 = scalar_lea.hbm %s3816_s15, 48 }
  0xce   :  { %p3338_p10 = scmp.ne.s32.totalorder %s3816_s15, %s3337_s12  ;;  %p3341_p11 = scmp.lt.u32.totalorder %s3337_s12, %s3816_s15 }
  0xd0   :  { %p3343_p12 = pnand %p3341_p11, %p3338_p10 }
  0xd2   :  { %3346 = shalt.err (!%p3343_p12)
}
  0xd3   :  { %s3347_s27 = scalar_lea.vmem %s162_s18, 48  ;;  %s3351_s1 = scalar_lea.vmem %s162_s18, 64 }
  0xd4   :  { %p3348_p13 = scmp.ne.s32.totalorder %s162_s18, %s3347_s27  ;;  %p3352_p0 = scmp.lt.s32.totalorder %s162_s18, %s162_s18 }
  0xd5   :  { %p3353_p1 = scmp.lt.s32.totalorder %s3351_s1, %s3347_s27 }
  0xd7   :  { %p3354_p2 = por %p3353_p1, %p3352_p0 }
  0xd9   :  { %p3355_p3 = pnand %p3354_p2, %p3348_p13 }
  0xdb   :  { %3358 = shalt.err (!%p3355_p3)
}
  0xdc   :  { %164 = dma.hbm_to_vmem [thread:$0]  %s3816_s15, 48, %s162_s18, [#allocation17]  }
  0xdd   :  { %3359 = dma.done.wait [#allocation3], 128  }
  0xde   :  { %3360 = vsyncadd [#allocation3], 4294967168 }
  0xdf   :  { %3361 = dma.done.wait [#allocation5], 256  }
  0xe0   :  { %3362 = vsyncadd [#allocation5], 4294967040 }
  0xe1   :  { %3363 = dma.done.wait [#allocation8], 6144  }
  0xe2   :  { %3364 = vsyncadd [#allocation8], 4294961152 }
  0xe3   :  { %3365 = dma.done.wait [#allocation11], 10240  }
  0xe4   :  { %3366 = vsyncadd [#allocation11], 4294957056 }
  0xe5   :  { %3367 = dma.done.wait [#allocation14], 2064  }
  0xe6   :  { %3368 = vsyncadd [#allocation14], 4294965232 }
  0xe7   :  { %3369 = dma.done.wait [#allocation17], 6192  }
  0xe8   :  { %3370 = vsyncadd [#allocation17], 4294961104  ;;  %v3388_v0 = vmov 0.0   ;;  %vm3389_vm0 = vmmov 0   ;;  %v2820_v1 = vld [vmem:[#allocation7] sm:$0xff]   ;;  %v2821_v2 = vld [vmem:[#allocation7 + $0x8] sm:$0xff]  }
  0xe9   :  { %2680 = vmatprep.subr.bf16.mxu0 %v3388_v0  ;;  %2696 = vmatprep.mubr.msk.bf16.mxu0 %vm3389_vm0, %v3388_v0  ;;  %v2822_v3 = vld [vmem:[#allocation7 + $0x10] sm:$0xff]   ;;  %v2828_v4 = vld [vmem:[#allocation9] sm:$0xff]   ;;  %v2823_v5 = vld [vmem:[#allocation7 + $0x18] sm:$0xff]   ;;  %s3853_s3 = sld [smem:[#allocation28_spill]]  ;;  %s3854_s24 = sld [smem:[#allocation30_spill]]  ;;  %v3390_v46 = vmov 0  }
  0xea   :  { %2700 = vmatprep.subr.bf16.mxu1 %v3388_v0  ;;  %2716 = vmatprep.mubr.msk.bf16.mxu1 %vm3389_vm0, %v3388_v0  ;;  %v2829_v6 = vld [vmem:[#allocation9 + $0x8] sm:$0xff]   ;;  %v2824_v7 = vld [vmem:[#allocation7 + $0x20] sm:$0xff]   ;;  %v2830_v8 = vld [vmem:[#allocation9 + $0x10] sm:$0xff]   ;;  %s3856_s14 = sld [smem:[#allocation32_spill]] }
  0xeb   :  { %2681 = vmatpush3.bf16.msra.mxu0 %v2820_v1  ;;  %2701 = vmatpush3.bf16.msra.mxu1 %v2828_v4  ;;  %v2825_v9 = vld [vmem:[#allocation7 + $0x28] sm:$0xff]   ;;  %v2831_v10 = vld [vmem:[#allocation9 + $0x18] sm:$0xff]   ;;  %v2826_v11 = vld [vmem:[#allocation7 + $0x30] sm:$0xff]  }
  0xec   :  { %2682 = vmatprep.subr.bf16.mxu0 %v3388_v0  ;;  %2702 = vmatprep.subr.bf16.mxu1 %v3388_v0  ;;  %v2832_v12 = vld [vmem:[#allocation9 + $0x20] sm:$0xff]   ;;  %v2827_v13 = vld [vmem:[#allocation7 + $0x38] sm:$0xff]   ;;  %v200_v15 = vld [vmem:[#allocation2] sm:$0xff] }
  0xed   :  { %v2833_v16 = vld [vmem:[#allocation9 + $0x28] sm:$0xff]   ;;  %v2834_v18 = vld [vmem:[#allocation9 + $0x30] sm:$0xff]   ;;  %v2835_v19 = vld [vmem:[#allocation9 + $0x38] sm:$0xff]  }
  0xee   :  { %v2836_v20 = vld [vmem:[#allocation10] ss:$8 sps:$4 sm:$0xff]   ;;  %v2838_v21 = vld [vmem:[#allocation10 + $0x4] ss:$8 sps:$4 sm:$0xff]   ;;  %v2841_v22 = vld [vmem:[#allocation10 + $0x14] ss:$8 sps:$4 sm:$0xff]  }
  0xef   :  { %2683 = vmatpush3.bf16.msra.mxu0 %v2821_v2  ;;  %2703 = vmatpush3.bf16.msra.mxu1 %v2829_v6  ;;  %v3673_v14 = vld [vmem:[%s3853_s3] sm:$0xff]  ;;  %v2839_v23 = vld [vmem:[#allocation10 + $0x10] ss:$8 sps:$4 sm:$0xff]   ;;  %v2847_v26 = vld [vmem:[#allocation10 + $0x34] ss:$8 sps:$4 sm:$0xff]  }
  0xf0   :  { %2684 = vmatprep.subr.bf16.mxu0 %v3388_v0  ;;  %2704 = vmatprep.subr.bf16.mxu1 %v3388_v0  ;;  %v201_v17 = vpack.c.bf16 %v3673_v14, %v200_v15  ;;  %v2844_v24 = vld [vmem:[#allocation10 + $0x24] ss:$8 sps:$4 sm:$0xff]   ;;  %v2842_v25 = vld [vmem:[#allocation10 + $0x20] ss:$8 sps:$4 sm:$0xff]   ;;  %v2845_v27 = vld [vmem:[#allocation10 + $0x30] ss:$8 sps:$4 sm:$0xff]  }
  0xf1   :  { %v2850_v28 = vld [vmem:[#allocation10 + $0x44] ss:$8 sps:$4 sm:$0xff]   ;;  %v2848_v29 = vld [vmem:[#allocation10 + $0x40] ss:$8 sps:$4 sm:$0xff]   ;;  %v2853_v30 = vld [vmem:[#allocation10 + $0x54] ss:$8 sps:$4 sm:$0xff]  }
  0xf2   :  { %v2851_v31 = vld [vmem:[#allocation10 + $0x50] ss:$8 sps:$4 sm:$0xff]   ;;  %v2365_v32 = vld [vmem:[%s3854_s24] ss:$0 sm:$0xff]  ;;  %v2856_v42 = vld [vmem:[#allocation10 + $0x64] ss:$8 sps:$4 sm:$0xff]  }
  0xf3   :  { %2685 = vmatpush3.bf16.msra.mxu0 %v2822_v3  ;;  %2705 = vmatpush3.bf16.msra.mxu1 %v2830_v8  ;;  %v2854_v43 = vld [vmem:[#allocation10 + $0x60] ss:$8 sps:$4 sm:$0xff]   ;;  %v2859_v44 = vld [vmem:[#allocation10 + $0x74] ss:$8 sps:$4 sm:$0xff]   ;;  %v2857_v45 = vld [vmem:[#allocation10 + $0x70] ss:$8 sps:$4 sm:$0xff]  }
  0xf4   :  { %2686 = vmatprep.subr.bf16.mxu0 %v3388_v0  ;;  %2706 = vmatprep.subr.bf16.mxu1 %v3388_v0  ;;  %v2868_v47 = vld [vmem:[#allocation12] ss:$8 sps:$4 sm:$0xff]   ;;  %v2870_v48 = vld [vmem:[#allocation12 + $0x4] ss:$8 sps:$4 sm:$0xff]   ;;  %v2873_v49 = vld [vmem:[#allocation12 + $0x14] ss:$8 sps:$4 sm:$0xff]  }
  0xf5   :  { %v2871_v50 = vld [vmem:[#allocation12 + $0x10] ss:$8 sps:$4 sm:$0xff]   ;;  %v2876_v51 = vld [vmem:[#allocation12 + $0x24] ss:$8 sps:$4 sm:$0xff]   ;;  %v2874_v52 = vld [vmem:[#allocation12 + $0x20] ss:$8 sps:$4 sm:$0xff]  }
  0xf6   :  { %v2879_v53 = vld [vmem:[#allocation12 + $0x34] ss:$8 sps:$4 sm:$0xff]   ;;  %v2877_v54 = vld [vmem:[#allocation12 + $0x30] ss:$8 sps:$4 sm:$0xff]   ;;  %v2882_v55 = vld [vmem:[#allocation12 + $0x44] ss:$8 sps:$4 sm:$0xff]  }
  0xf7   :  { %2687 = vmatpush3.bf16.msra.mxu0 %v2823_v5  ;;  %2707 = vmatpush3.bf16.msra.mxu1 %v2831_v10  ;;  %v2880_v56 = vld [vmem:[#allocation12 + $0x40] ss:$8 sps:$4 sm:$0xff]   ;;  %v2885_v57 = vld [vmem:[#allocation12 + $0x54] ss:$8 sps:$4 sm:$0xff]   ;;  %v2883_v58 = vld [vmem:[#allocation12 + $0x50] ss:$8 sps:$4 sm:$0xff]  }
  0xf8   :  { %2688 = vmatprep.subr.bf16.mxu0 %v3388_v0  ;;  %2708 = vmatprep.subr.bf16.mxu1 %v3388_v0  ;;  %v2888_v59 = vld [vmem:[#allocation12 + $0x64] ss:$8 sps:$4 sm:$0xff]   ;;  %v2886_v60 = vld [vmem:[#allocation12 + $0x60] ss:$8 sps:$4 sm:$0xff]   ;;  %v2891_v61 = vld [vmem:[#allocation12 + $0x74] ss:$8 sps:$4 sm:$0xff]  }
  0xf9   :  { %v2889_v62 = vld [vmem:[#allocation12 + $0x70] ss:$8 sps:$4 sm:$0xff]   ;;  %v2894_v63 = vld [vmem:[#allocation12 + $0x84] ss:$8 sps:$4 sm:$0xff]   ;;  %v2892_v1 = vld [vmem:[#allocation12 + $0x80] ss:$8 sps:$4 sm:$0xff]  }
  0xfa   :  { %v2897_v2 = vld [vmem:[#allocation12 + $0x94] ss:$8 sps:$4 sm:$0xff]   ;;  %v2895_v3 = vld [vmem:[#allocation12 + $0x90] ss:$8 sps:$4 sm:$0xff]   ;;  %v2900_v4 = vld [vmem:[#allocation12 + $0xa4] ss:$8 sps:$4 sm:$0xff]  }
  0xfb   :  { %2689 = vmatpush3.bf16.msra.mxu0 %v2824_v7  ;;  %2709 = vmatpush3.bf16.msra.mxu1 %v2832_v12  ;;  %v2898_v5 = vld [vmem:[#allocation12 + $0xa0] ss:$8 sps:$4 sm:$0xff]   ;;  %v2903_v6 = vld [vmem:[#allocation12 + $0xb4] ss:$8 sps:$4 sm:$0xff]   ;;  %v2901_v7 = vld [vmem:[#allocation12 + $0xb0] ss:$8 sps:$4 sm:$0xff]  }
  0xfc   :  { %2690 = vmatprep.subr.bf16.mxu0 %v3388_v0  ;;  %2710 = vmatprep.subr.bf16.mxu1 %v3388_v0  ;;  %v2906_v8 = vld [vmem:[#allocation12 + $0xc4] ss:$8 sps:$4 sm:$0xff]   ;;  %v2909_v10 = vld [vmem:[#allocation12 + $0xd4] ss:$8 sps:$4 sm:$0xff]   ;;  %v2374_v12 = vld [vmem:[%s3808_s7] ss:$0 sm:$0xff] }
  0xff   :  { %2691 = vmatpush3.bf16.msra.mxu0 %v2825_v9  ;;  %2711 = vmatpush3.bf16.msra.mxu1 %v2833_v16  ;;  %v2904_v9 = vld [vmem:[#allocation12 + $0xc0] ss:$8 sps:$4 sm:$0xff]  }
 0x100   :  { %2692 = vmatprep.subr.bf16.mxu0 %v3388_v0  ;;  %2712 = vmatprep.subr.bf16.mxu1 %v3388_v0 }
 0x103   :  { %2693 = vmatpush3.bf16.msra.mxu0 %v2826_v11  ;;  %2713 = vmatpush3.bf16.msra.mxu1 %v2834_v18  ;;  %v2907_v11 = vld [vmem:[#allocation12 + $0xd0] ss:$8 sps:$4 sm:$0xff]  }
 0x104   :  { %2694 = vmatprep.subr.bf16.mxu0 %v3388_v0  ;;  %2714 = vmatprep.subr.bf16.mxu1 %v3388_v0 }
 0x107   :  { %2695 = vmatpush3.bf16.msra.mxu0 %v2827_v13  ;;  %2715 = vmatpush3.bf16.msra.mxu1 %v2835_v19 }
 0x108   :  { %540 = vmatprep.subr.bf16.mxu0 %v2838_v21  ;;  %793 = vmatprep.subr.bf16.mxu1 %v2870_v48  ;;  %v448_v48 = vld [vmem:[%s3810_s9] sm:$0x3] }
 0x10a   :  { %2697 = vmatmul.mubr.bf16.vlgmr.msra.gmra.mrb[0].mxu0 %v201_v17 }
 0x10b   :  { %541 = vmatpush1.bf16.msra.mxu0 %v2836_v20  ;;  %572 = vmatprep.mubr.bf16.mxu0 %v3390_v46 }
 0x10c   :  { %542 = vmatprep.subr.bf16.mxu0 %v2841_v22  ;;  %v2860_v22 = vld [vmem:[#allocation7 + $0x40] sm:$0xff]  }
 0x10f   :  { %543 = vmatpush1.bf16.msra.mxu0 %v2839_v23 }
 0x110   :  { %544 = vmatprep.subr.bf16.mxu0 %v2844_v24  ;;  %v2861_v24 = vld [vmem:[#allocation7 + $0x48] sm:$0xff]  }
 0x113   :  { %545 = vmatpush1.bf16.msra.mxu0 %v2842_v25  ;;  %v2862_v25 = vld [vmem:[#allocation7 + $0x50] sm:$0xff]  }
 0x114   :  { %546 = vmatprep.subr.bf16.mxu0 %v2847_v26  ;;  %v2863_v26 = vld [vmem:[#allocation7 + $0x58] sm:$0xff]  }
 0x117   :  { %547 = vmatpush1.bf16.msra.mxu0 %v2845_v27  ;;  %v2864_v27 = vld [vmem:[#allocation7 + $0x60] sm:$0xff]  }
 0x118   :  { %548 = vmatprep.subr.bf16.mxu0 %v2850_v28  ;;  %v2865_v28 = vld [vmem:[#allocation7 + $0x68] sm:$0xff]  }
 0x11b   :  { %549 = vmatpush1.bf16.msra.mxu0 %v2848_v29  ;;  %v2866_v29 = vld [vmem:[#allocation7 + $0x70] sm:$0xff]  }
 0x11c   :  { %550 = vmatprep.subr.bf16.mxu0 %v2853_v30  ;;  %v2867_v30 = vld [vmem:[#allocation7 + $0x78] sm:$0xff]  }
 0x11f   :  { %551 = vmatpush1.bf16.msra.mxu0 %v2851_v31  ;;  %v874_v31 = vld [vmem:[#allocation4] sm:$0xff] }
 0x120   :  { %552 = vmatprep.subr.bf16.mxu0 %v2856_v42  ;;  %v2922_v42 = vld [vmem:[#allocation9 + $0x70] sm:$0xff]  }
 0x123   :  { %553 = vmatpush1.bf16.msra.mxu0 %v2854_v43  ;;  %v2923_v43 = vld [vmem:[#allocation9 + $0x78] sm:$0xff]  }
 0x124   :  { %554 = vmatprep.subr.bf16.mxu0 %v2859_v44  ;;  %v450_v44 = vlaneseq }
 0x127   :  { %555 = vmatpush1.bf16.msra.mxu0 %v2857_v45  ;;  %v3709_v45 = vshrl.u32 %v450_v44, 7 }
 0x128   :  { %2720 = vmatprep.subr.bf16.mxu0 %v3388_v0 }
 0x1dd   :  { %v307_v33 = vpop.f32.mrb[0].mxu0 }
 0x1de   :  { %v308_v34 = vadd.f32 %v2365_v32, %v307_v33  ;;  %v2698_v35 = vpop.f32.mrb[1].mxu0  ;;  %v2912_v33 = vld [vmem:[#allocation12 + $0xe4] ss:$8 sps:$4 sm:$0xff]  }
 0x1df   :  { %v310_v36 = vpop.f32.mrb[2].mxu0  ;;  %v2915_v35 = vld [vmem:[#allocation12 + $0xf4] ss:$8 sps:$4 sm:$0xff]  }
 0x1e0   :  { %v311_v37 = vadd.f32 %v2365_v32, %v310_v36  ;;  %v2699_v38 = vpop.f32.mrb[3].mxu0  ;;  %v314_v39 = vmax.f32 %v308_v34, 0.0  ;;  %v875_v32 = vpack.c.bf16 %v3673_v14, %v874_v31  ;;  %v2910_v34 = vld [vmem:[#allocation12 + $0xe0] ss:$8 sps:$4 sm:$0xff]   ;;  %v2913_v36 = vld [vmem:[#allocation12 + $0xf0] ss:$8 sps:$4 sm:$0xff]  }
 0x1e1   :  { %v2917_v14 = vld [vmem:[#allocation9 + $0x48] sm:$0xff]   ;;  %v2918_v38 = vld [vmem:[#allocation9 + $0x50] sm:$0xff]   ;;  %v2957_v31 = vld [vmem:[#allocation13] sm:$0xff]  }
 0x1e2   :  { %v315_v40 = vmax.f32 %v311_v37, 0.0  ;;  %v2916_v37 = vld [vmem:[#allocation9 + $0x40] sm:$0xff]  }
 0x1e4   :  { %v316_v41 = vpack.c.bf16 %v315_v40, %v314_v39  ;;  %v2919_v39 = vld [vmem:[#allocation9 + $0x58] sm:$0xff]   ;;  %v2920_v40 = vld [vmem:[#allocation9 + $0x60] sm:$0xff]  }
 0x1e6   :  { %2717 = vmatmul.mubr.bf16.vlgmr.msra.gmra.mrb[0].mxu1 %v316_v41  ;;  %v2921_v41 = vld [vmem:[#allocation9 + $0x68] sm:$0xff]  }
 0x1e7   :  { %794 = vmatpush1.bf16.msra.mxu1 %v2868_v47  ;;  %v3712_v47 = vsub.s32 0, %v3709_v45 }
 0x1e8   :  { %795 = vmatprep.subr.bf16.mxu1 %v2873_v49  ;;  %v3718_v49 = vsub.s32 1, %v3709_v45 }
 0x1eb   :  { %796 = vmatpush1.bf16.msra.mxu1 %v2871_v50  ;;  %v453_v50 = vrot.slane %v448_v48, %v3712_v47 }
 0x1ec   :  { %797 = vmatprep.subr.bf16.mxu1 %v2876_v51  ;;  %v457_v51 = vrot.slane %v448_v48, %v3718_v49 }
 0x1ef   :  { %798 = vmatpush1.bf16.msra.mxu1 %v2874_v52 }
 0x1f0   :  { %799 = vmatprep.subr.bf16.mxu1 %v2879_v53 }
 0x1f3   :  { %800 = vmatpush1.bf16.msra.mxu1 %v2877_v54 }
 0x1f4   :  { %801 = vmatprep.subr.bf16.mxu1 %v2882_v55 }
 0x1f7   :  { %802 = vmatpush1.bf16.msra.mxu1 %v2880_v56 }
 0x1f8   :  { %803 = vmatprep.subr.bf16.mxu1 %v2885_v57 }
 0x1fb   :  { %804 = vmatpush1.bf16.msra.mxu1 %v2883_v58 }
 0x1fc   :  { %805 = vmatprep.subr.bf16.mxu1 %v2888_v59 }
 0x1ff   :  { %806 = vmatpush1.bf16.msra.mxu1 %v2886_v60 }
 0x200   :  { %807 = vmatprep.subr.bf16.mxu1 %v2891_v61 }
 0x203   :  { %808 = vmatpush1.bf16.msra.mxu1 %v2889_v62 }
 0x204   :  { %809 = vmatprep.subr.bf16.mxu1 %v2894_v63 }
 0x207   :  { %810 = vmatpush1.bf16.msra.mxu1 %v2892_v1 }
 0x208   :  { %811 = vmatprep.subr.bf16.mxu1 %v2897_v2 }
 0x20b   :  { %812 = vmatpush1.bf16.msra.mxu1 %v2895_v3  ;;  %v2434_v3 = vld [vmem:[%s3854_s24 + $0x1] ss:$0 sm:$0xff] }
 0x20c   :  { %813 = vmatprep.subr.bf16.mxu1 %v2900_v4 }
 0x20f   :  { %814 = vmatpush1.bf16.msra.mxu1 %v2898_v5 }
 0x210   :  { %815 = vmatprep.subr.bf16.mxu1 %v2903_v6 }
 0x213   :  { %816 = vmatpush1.bf16.msra.mxu1 %v2901_v7 }
 0x214   :  { %817 = vmatprep.subr.bf16.mxu1 %v2906_v8 }
 0x217   :  { %818 = vmatpush1.bf16.msra.mxu1 %v2904_v9 }
 0x218   :  { %819 = vmatprep.subr.bf16.mxu1 %v2909_v10 }
 0x21b   :  { %820 = vmatpush1.bf16.msra.mxu1 %v2907_v11 }
 0x21c   :  { %821 = vmatprep.subr.bf16.mxu1 %v2912_v33  ;;  %v2959_v33 = vld [vmem:[#allocation13 + $0x8] sm:$0xff]  }
 0x21f   :  { %822 = vmatpush1.bf16.msra.mxu1 %v2910_v34  ;;  %v2960_v34 = vld [vmem:[#allocation13 + $0x50] sm:$0xff]  }
 0x220   :  { %823 = vmatprep.subr.bf16.mxu1 %v2915_v35  ;;  %v2961_v35 = vld [vmem:[#allocation13 + $0x10] sm:$0xff]  }
 0x223   :  { %824 = vmatpush1.bf16.msra.mxu1 %v2913_v36  ;;  %v2962_v36 = vld [vmem:[#allocation13 + $0x58] sm:$0xff]  }
 0x2b9   :  { %v422_v13 = vpop.f32.mrb[0].mxu1 }
 0x2ba   :  { %v423_v15 = vadd.f32 %v2374_v12, %v422_v13  ;;  %v2718_v16 = vpop.f32.mrb[1].mxu1  ;;  %v2926_v13 = vld [vmem:[#allocation10 + $0x84] ss:$8 sps:$4 sm:$0xff]  }
 0x2bb   :  { %v425_v17 = vpop.f32.mrb[2].mxu1  ;;  %1220 = vmatprep.subr.bf16.mxu1 %v2926_v13  ;;  %v2929_v16 = vld [vmem:[#allocation10 + $0x94] ss:$8 sps:$4 sm:$0xff]  }
 0x2bc   :  { %v426_v18 = vadd.f32 %v2374_v12, %v425_v17  ;;  %v2719_v19 = vpop.f32.mrb[3].mxu1  ;;  %v429_v20 = vmax.f32 %v423_v15, 0.0  ;;  %v2924_v15 = vld [vmem:[#allocation10 + $0x80] ss:$8 sps:$4 sm:$0xff]   ;;  %v2927_v17 = vld [vmem:[#allocation10 + $0x90] ss:$8 sps:$4 sm:$0xff]  }
 0x2bd   :  { %v2930_v19 = vld [vmem:[#allocation10 + $0xa0] ss:$8 sps:$4 sm:$0xff]  }
 0x2be   :  { %v430_v21 = vmax.f32 %v426_v18, 0.0  ;;  %v2932_v18 = vld [vmem:[#allocation10 + $0xa4] ss:$8 sps:$4 sm:$0xff]  }
 0x2c0   :  { %v431_v23 = vpack.c.bf16 %v430_v21, %v429_v20  ;;  %v2935_v20 = vld [vmem:[#allocation10 + $0xb4] ss:$8 sps:$4 sm:$0xff]   ;;  %v2933_v21 = vld [vmem:[#allocation10 + $0xb0] ss:$8 sps:$4 sm:$0xff]  }
 0x2c2   :  { %573 = vmatmul.mubr.bf16.vlgmr.msra.gmra.mrb[4].mxu0 %v431_v23  ;;  %v2936_v23 = vld [vmem:[#allocation10 + $0xc0] ss:$8 sps:$4 sm:$0xff]  }
 0x2c3   :  { %2721 = vmatpush3.bf16.msra.mxu0 %v2860_v22  ;;  %2736 = vmatprep.mubr.msk.bf16.mxu0 %vm3389_vm0, %v3388_v0  ;;  %v2938_v22 = vld [vmem:[#allocation10 + $0xc4] ss:$8 sps:$4 sm:$0xff]  }
 0x2c4   :  { %2722 = vmatprep.subr.bf16.mxu0 %v3388_v0 }
 0x2c7   :  { %2723 = vmatpush3.bf16.msra.mxu0 %v2861_v24  ;;  %v2941_v24 = vld [vmem:[#allocation10 + $0xd4] ss:$8 sps:$4 sm:$0xff]  }
 0x2c8   :  { %2724 = vmatprep.subr.bf16.mxu0 %v3388_v0 }
 0x2cb   :  { %2725 = vmatpush3.bf16.msra.mxu0 %v2862_v25  ;;  %v2939_v25 = vld [vmem:[#allocation10 + $0xd0] ss:$8 sps:$4 sm:$0xff]  }
 0x2cc   :  { %2726 = vmatprep.subr.bf16.mxu0 %v3388_v0 }
 0x2cf   :  { %2727 = vmatpush3.bf16.msra.mxu0 %v2863_v26  ;;  %v2944_v26 = vld [vmem:[#allocation10 + $0xe4] ss:$8 sps:$4 sm:$0xff]  }
 0x2d0   :  { %2728 = vmatprep.subr.bf16.mxu0 %v3388_v0 }
 0x2d3   :  { %2729 = vmatpush3.bf16.msra.mxu0 %v2864_v27  ;;  %v2942_v27 = vld [vmem:[#allocation10 + $0xe0] ss:$8 sps:$4 sm:$0xff]  }
 0x2d4   :  { %2730 = vmatprep.subr.bf16.mxu0 %v3388_v0 }
 0x2d7   :  { %2731 = vmatpush3.bf16.msra.mxu0 %v2865_v28  ;;  %v2947_v28 = vld [vmem:[#allocation10 + $0xf4] ss:$8 sps:$4 sm:$0xff]  }
 0x2d8   :  { %2732 = vmatprep.subr.bf16.mxu0 %v3388_v0 }
 0x2db   :  { %2733 = vmatpush3.bf16.msra.mxu0 %v2866_v29  ;;  %v2945_v29 = vld [vmem:[#allocation10 + $0xf0] ss:$8 sps:$4 sm:$0xff]  }
 0x2dc   :  { %2734 = vmatprep.subr.bf16.mxu0 %v3388_v0 }
 0x2df   :  { %2735 = vmatpush3.bf16.msra.mxu0 %v2867_v30  ;;  %v2956_v30 = vld [vmem:[#allocation13 + $0x40] sm:$0xff]  }
 0x2e0   :  { %2740 = vmatprep.subr.bf16.mxu0 %v3388_v0 }
 0x2e2   :  { %2737 = vmatmul.mubr.bf16.vlgmr.msra.gmra.mrb[8].mxu0 %v875_v32  ;;  %v2958_v32 = vld [vmem:[#allocation13 + $0x48] sm:$0xff]  }
 0x2e3   :  { %2756 = vmatprep.mubr.msk.bf16.mxu0 %vm3389_vm0, %v3388_v0  ;;  %2741 = vmatpush3.bf16.msra.mxu0 %v2916_v37  ;;  %v2963_v37 = vld [vmem:[#allocation13 + $0x18] sm:$0xff]  }
 0x2e4   :  { %2742 = vmatprep.subr.bf16.mxu0 %v3388_v0 }
 0x2e7   :  { %2743 = vmatpush3.bf16.msra.mxu0 %v2917_v14  ;;  %v2964_v14 = vld [vmem:[#allocation13 + $0x60] sm:$0xff]  }
 0x2e8   :  { %2744 = vmatprep.subr.bf16.mxu0 %v3388_v0 }
 0x2eb   :  { %2745 = vmatpush3.bf16.msra.mxu0 %v2918_v38  ;;  %v2965_v38 = vld [vmem:[#allocation13 + $0x20] sm:$0xff]  }
 0x2ec   :  { %2746 = vmatprep.subr.bf16.mxu0 %v3388_v0 }
 0x2ef   :  { %2747 = vmatpush3.bf16.msra.mxu0 %v2919_v39  ;;  %v2966_v39 = vld [vmem:[#allocation13 + $0x68] sm:$0xff]  }
 0x2f0   :  { %2748 = vmatprep.subr.bf16.mxu0 %v3388_v0 }
 0x2f3   :  { %2749 = vmatpush3.bf16.msra.mxu0 %v2920_v40  ;;  %v2967_v40 = vld [vmem:[#allocation13 + $0x28] sm:$0xff]  }
 0x2f4   :  { %2750 = vmatprep.subr.bf16.mxu0 %v3388_v0 }
 0x2f7   :  { %2751 = vmatpush3.bf16.msra.mxu0 %v2921_v41  ;;  %v621_v41 = vld [vmem:[%s3812_s11] sm:$0x3] }
 0x2f8   :  { %2752 = vmatprep.subr.bf16.mxu0 %v3388_v0 }
 0x2fb   :  { %2753 = vmatpush3.bf16.msra.mxu0 %v2922_v42  ;;  %v626_v42 = vrot.slane %v621_v41, %v3712_v47 }
 0x2fc   :  { %2754 = vmatprep.subr.bf16.mxu0 %v3388_v0 }
 0x2ff   :  { %2755 = vmatpush3.bf16.msra.mxu0 %v2923_v43  ;;  %v630_v43 = vrot.slane %v621_v41, %v3718_v49 }
 0x300   :  { %2618 = vmatprep.subr.bf16.mxu0 %v2956_v30  ;;  %v2952_v30 = vld [vmem:[#allocation7 + $0xa0] sm:$0xff]  }
 0x395   :  { %v574_v52 = vpop.f32.mrb[4].mxu0 }
 0x396   :  { %v575_v53 = vadd.f32 %v574_v52, %v453_v50  ;;  %v576_v54 = vpop.f32.mrb[5].mxu0 }
 0x397   :  { %v577_v55 = vadd.f32 %v576_v54, %v457_v51  ;;  %v578_v56 = vpop.f32.mrb[6].mxu0 }
 0x398   :  { %v579_v57 = vadd.f32 %v578_v56, %v453_v50  ;;  %v580_v58 = vpop.f32.mrb[7].mxu0  ;;  %v583_v60 = vmax.f32 %v575_v53, 0.0 }
 0x399   :  { %v581_v59 = vadd.f32 %v580_v58, %v457_v51  ;;  %v584_v62 = vmax.f32 %v577_v55, 0.0 }
 0x39a   :  { %v585_v61 = vmax.f32 %v579_v57, 0.0 }
 0x39b   :  { %v586_v63 = vmax.f32 %v581_v59, 0.0 }
 0x39c   :  { %v587_v1 = vpack.c.bf16 %v585_v61, %v583_v60 }
 0x39d   :  { %v588_v2 = vpack.c.bf16 %v586_v63, %v584_v62 }
 0x39f   :  { %825 = vmatprep.mubr.bf16.mxu1 %v588_v2 }
 0x3a0   :  { %826 = vmatmul.mubr.bf16.vlgmr.msra.gmra.mrb[4].mxu1 %v587_v1 }
 0x3a1   :  { %1252 = vmatprep.mubr.bf16.mxu1 %v3390_v46  ;;  %1221 = vmatpush1.bf16.msra.mxu1 %v2924_v15 }
 0x3a2   :  { %1222 = vmatprep.subr.bf16.mxu1 %v2929_v16 }
 0x3a5   :  { %1223 = vmatpush1.bf16.msra.mxu1 %v2927_v17 }
 0x3a6   :  { %1224 = vmatprep.subr.bf16.mxu1 %v2932_v18 }
 0x3a9   :  { %1225 = vmatpush1.bf16.msra.mxu1 %v2930_v19 }
 0x3aa   :  { %1226 = vmatprep.subr.bf16.mxu1 %v2935_v20 }
 0x3ad   :  { %1227 = vmatpush1.bf16.msra.mxu1 %v2933_v21 }
 0x3ae   :  { %1228 = vmatprep.subr.bf16.mxu1 %v2938_v22 }
 0x3b1   :  { %1229 = vmatpush1.bf16.msra.mxu1 %v2936_v23 }
 0x3b2   :  { %1230 = vmatprep.subr.bf16.mxu1 %v2941_v24 }
 0x3b5   :  { %v983_v4 = vpop.f32.mrb[8].mxu0  ;;  %1231 = vmatpush1.bf16.msra.mxu1 %v2939_v25  ;;  %v2948_v25 = vld [vmem:[#allocation7 + $0x80] sm:$0xff]  }
 0x3b6   :  { %v984_v5 = vadd.f32 %v2434_v3, %v983_v4  ;;  %v2738_v6 = vpop.f32.mrb[9].mxu0  ;;  %1232 = vmatprep.subr.bf16.mxu1 %v2944_v26 }
 0x3b7   :  { %v986_v7 = vpop.f32.mrb[10].mxu0 }
 0x3b8   :  { %v987_v8 = vadd.f32 %v2434_v3, %v986_v7  ;;  %v2739_v9 = vpop.f32.mrb[11].mxu0  ;;  %v990_v10 = vmax.f32 %v984_v5, 0.0 }
 0x3b9   :  { %1233 = vmatpush1.bf16.msra.mxu1 %v2942_v27  ;;  %v2444_v9 = vld [vmem:[%s3808_s7 + $0x1] ss:$0 sm:$0xff] }
 0x3ba   :  { %v991_v11 = vmax.f32 %v987_v8, 0.0  ;;  %1234 = vmatprep.subr.bf16.mxu1 %v2947_v28  ;;  %v2949_v27 = vld [vmem:[#allocation7 + $0x88] sm:$0xff]   ;;  %v2950_v28 = vld [vmem:[#allocation7 + $0x90] sm:$0xff]  }
 0x3bc   :  { %v992_v12 = vpack.c.bf16 %v991_v11, %v990_v10 }
 0x3bd   :  { %1235 = vmatpush1.bf16.msra.mxu1 %v2945_v29  ;;  %v2951_v29 = vld [vmem:[#allocation7 + $0x98] sm:$0xff]  }
 0x3be   :  { %2757 = vmatmul.mubr.bf16.vlgmr.msra.gmra.mrb[12].mxu0 %v992_v12  ;;  %2760 = vmatprep.subr.bf16.mxu1 %v3388_v0 }
 0x3bf   :  { %2619 = vmatpush3.bf16.msra.mxu0 %v2957_v31  ;;  %v2953_v31 = vld [vmem:[#allocation7 + $0xa8] sm:$0xff]  }
 0x3c0   :  { %2620 = vmatprep.subr.bf16.mxu0 %v2958_v32  ;;  %v2954_v32 = vld [vmem:[#allocation7 + $0xb0] sm:$0xff]  }
 0x3c3   :  { %2621 = vmatpush3.bf16.msra.mxu0 %v2959_v33  ;;  %v2955_v33 = vld [vmem:[#allocation7 + $0xb8] sm:$0xff]  }
 0x3c4   :  { %2622 = vmatprep.subr.bf16.mxu0 %v2960_v34  ;;  %v1459_v34 = vld [vmem:[#allocation6] sm:$0xff] }
 0x3c7   :  { %2623 = vmatpush3.bf16.msra.mxu0 %v2961_v35  ;;  %v3116_v35 = vld [vmem:[%s3853_s3] sm:$0xff] }
 0x3c8   :  { %2624 = vmatprep.subr.bf16.mxu0 %v2962_v36  ;;  %v1460_v36 = vpack.c.bf16 %v3116_v35, %v1459_v34  ;;  %v3007_v34 = vld [vmem:[#allocation16 + $0x18] ss:$12 sps:$4 sm:$0xff]   ;;  %v3012_v35 = vld [vmem:[#allocation16 + $0x34] ss:$12 sps:$4 sm:$0xff]  }
 0x3cb   :  { %2625 = vmatpush3.bf16.msra.mxu0 %v2963_v37  ;;  %v2968_v37 = vld [vmem:[#allocation13 + $0x70] sm:$0xff]  }
 0x3cc   :  { %2626 = vmatprep.subr.bf16.mxu0 %v2964_v14  ;;  %v2969_v14 = vld [vmem:[#allocation13 + $0x30] sm:$0xff]  }
 0x3cf   :  { %2627 = vmatpush3.bf16.msra.mxu0 %v2965_v38  ;;  %v2970_v38 = vld [vmem:[#allocation13 + $0x78] sm:$0xff]  }
 0x3d0   :  { %2628 = vmatprep.subr.bf16.mxu0 %v2966_v39  ;;  %v2971_v39 = vld [vmem:[#allocation13 + $0x38] sm:$0xff]  }
 0x3d3   :  { %2629 = vmatpush3.bf16.msra.mxu0 %v2967_v40  ;;  %v2453_v40 = vld [vmem:[%s3810_s9 + $0x2] sm:$0x3] }
 0x3d4   :  { %2630 = vmatprep.subr.bf16.mxu0 %v2968_v37  ;;  %v1133_v41 = vrot.slane %v2453_v40, %v3712_v47  ;;  %v3010_v37 = vld [vmem:[#allocation16 + $0x30] ss:$12 sps:$4 sm:$0xff]  }
 0x3d7   :  { %2631 = vmatpush3.bf16.msra.mxu0 %v2969_v14  ;;  %v3015_v14 = vld [vmem:[#allocation16 + $0x4c] ss:$12 sps:$4 sm:$0xff]  }
 0x3d8   :  { %2632 = vmatprep.subr.bf16.mxu0 %v2970_v38  ;;  %v3013_v38 = vld [vmem:[#allocation16 + $0x48] ss:$12 sps:$4 sm:$0xff]  }
 0x3db   :  { %2633 = vmatpush3.bf16.msra.mxu0 %v2971_v39  ;;  %v3018_v39 = vld [vmem:[#allocation16 + $0x64] ss:$12 sps:$4 sm:$0xff]  }
 0x3dc   :  { %2780 = vmatprep.subr.bf16.mxu0 %v3388_v0 }
 0x473   :  { %v827_v44 = vpop.f32.mrb[4].mxu1 }
 0x474   :  { %v828_v48 = vadd.f32 %v827_v44, %v626_v42  ;;  %v829_v50 = vpop.f32.mrb[5].mxu1 }
 0x475   :  { %v830_v51 = vadd.f32 %v829_v50, %v630_v43  ;;  %v831_v52 = vpop.f32.mrb[6].mxu1 }
 0x476   :  { %v836_v53 = vsub.f32 0.0, %v828_v48  ;;  %v832_v54 = vadd.f32 %v831_v52, %v626_v42  ;;  %v833_v55 = vpop.f32.mrb[7].mxu1  ;;  %v1137_v42 = vrot.slane %v2453_v40, %v3718_v49  ;;  %v3016_v40 = vld [vmem:[#allocation16 + $0x60] ss:$12 sps:$4 sm:$0xff]  }
 0x477   :  { %v837_v56 = vsub.f32 0.0, %v830_v51  ;;  %v834_v57 = vadd.f32 %v833_v55, %v630_v43 }
 0x478   :  { %v840_v58 = vmul.f32 1.442695, %v836_v53  ;;  %v838_v59 = vsub.f32 0.0, %v832_v54 }
 0x479   :  { %v842_v60 = vmul.f32 1.442695, %v837_v56  ;;  %v839_v61 = vsub.f32 0.0, %v834_v57 }
 0x47a   :  { %3068 = vpow2.f32 %v840_v58  ;;  %v844_v62 = vmul.f32 1.442695, %v838_v59 }
 0x47b   :  { %3070 = vpow2.f32 %v842_v60  ;;  %v846_v63 = vmul.f32 1.442695, %v839_v61  ;;  %v2972_v60 = vld [vmem:[#allocation9 + $0x80] sm:$0xff]   ;;  %v2973_v61 = vld [vmem:[#allocation9 + $0x88] sm:$0xff]  }
 0x47c   :  { %3072 = vpow2.f32 %v844_v62  ;;  %v2974_v62 = vld [vmem:[#allocation9 + $0x90] sm:$0xff]  }
 0x47d   :  { %3074 = vpow2.f32 %v846_v63  ;;  %v2975_v63 = vld [vmem:[#allocation9 + $0x98] sm:$0xff]  }
 0x484   :  { %v3069_v1 = vpop.eup %3068 }
 0x485   :  { %v3071_v2 = vpop.eup %3070  ;;  %v848_v3 = vadd.f32 1.0, %v3069_v1  ;;  %v2976_v1 = vld [vmem:[#allocation9 + $0xa0] sm:$0xff]  }
 0x486   :  { %v3073_v4 = vpop.eup %3072  ;;  %v849_v5 = vadd.f32 1.0, %v3071_v2  ;;  %v2977_v2 = vld [vmem:[#allocation9 + $0xa8] sm:$0xff]  }
 0x487   :  { %v3075_v6 = vpop.eup %3074  ;;  %3076 = vrcp.f32 %v848_v3  ;;  %v850_v7 = vadd.f32 1.0, %v3073_v4  ;;  %v2488_v3 = vld [vmem:[%s3854_s24 + $0x2] ss:$0 sm:$0xff]  ;;  %s3855_s24 = sld [smem:[#allocation31_spill]] }
 0x488   :  { %3078 = vrcp.f32 %v849_v5  ;;  %v851_v8 = vadd.f32 1.0, %v3075_v6  ;;  %v2978_v5 = vld [vmem:[#allocation9 + $0xb0] sm:$0xff]  }
 0x489   :  { %3080 = vrcp.f32 %v850_v7 }
 0x48a   :  { %3082 = vrcp.f32 %v851_v8 }
 0x491   :  { %v3077_v10 = vpop.eup %3076  ;;  %v1100_v11 = vpop.f32.mrb[12].mxu0 }
 0x492   :  { %v3079_v12 = vpop.eup %3078  ;;  %v1101_v13 = vadd.f32 %v2444_v9, %v1100_v11  ;;  %v2758_v15 = vpop.f32.mrb[13].mxu0 }
 0x493   :  { %v3081_v16 = vpop.eup %3080  ;;  %v2576_v17 = vpack.c.bf16 %v3079_v12, %v3077_v10  ;;  %v1103_v18 = vpop.f32.mrb[14].mxu0  ;;  %v2979_v12 = vld [vmem:[#allocation9 + $0xb8] sm:$0xff]  }
 0x494   :  { %v3083_v19 = vpop.eup %3082  ;;  %v1104_v20 = vadd.f32 %v2444_v9, %v1103_v18  ;;  %v2759_v21 = vpop.f32.mrb[15].mxu0  ;;  %v1107_v23 = vmax.f32 %v1101_v13, 0.0  ;;  %v2985_v18 = vld [vmem:[#allocation10 + $0x114] ss:$8 sps:$4 sm:$0xff]  }
 0x495   :  { %864 = vst [vmem:[%s3817_s16] sm:$0xff] %v2576_v17  ;;  %v2577_v22 = vpack.c.bf16 %v3083_v19, %v3081_v16  ;;  %v2982_v16 = vld [vmem:[#allocation10 + $0x104] ss:$8 sps:$4 sm:$0xff]   ;;  %v2980_v17 = vld [vmem:[#allocation10 + $0x100] ss:$8 sps:$4 sm:$0xff]   ;;  %v2983_v19 = vld [vmem:[#allocation10 + $0x110] ss:$8 sps:$4 sm:$0xff]  }
 0x496   :  { %v1108_v24 = vmax.f32 %v1104_v20, 0.0  ;;  %v2988_v20 = vld [vmem:[#allocation10 + $0x124] ss:$8 sps:$4 sm:$0xff]   ;;  %v2986_v21 = vld [vmem:[#allocation10 + $0x120] ss:$8 sps:$4 sm:$0xff]  }
 0x497   :  { %873 = vst [vmem:[%s3820_s19] sm:$0xff] %v2577_v22  ;;  %v2991_v22 = vld [vmem:[#allocation10 + $0x134] ss:$8 sps:$4 sm:$0xff]  }
 0x498   :  { %v1109_v26 = vpack.c.bf16 %v1108_v24, %v1107_v23  ;;  %v2989_v23 = vld [vmem:[#allocation10 + $0x130] ss:$8 sps:$4 sm:$0xff]   ;;  %v2992_v24 = vld [vmem:[#allocation10 + $0x140] ss:$8 sps:$4 sm:$0xff]  }
 0x49a   :  { %1253 = vmatmul.mubr.bf16.vlgmr.msra.gmra.mrb[8].mxu1 %v1109_v26  ;;  %v2995_v26 = vld [vmem:[#allocation10 + $0x150] ss:$8 sps:$4 sm:$0xff]  }
 0x49b   :  { %2761 = vmatpush3.bf16.msra.mxu1 %v2948_v25  ;;  %2776 = vmatprep.mubr.msk.bf16.mxu1 %vm3389_vm0, %v3388_v0  ;;  %v2997_v25 = vld [vmem:[#allocation10 + $0x154] ss:$8 sps:$4 sm:$0xff]  }
 0x49c   :  { %2762 = vmatprep.subr.bf16.mxu1 %v3388_v0 }
 0x49f   :  { %2763 = vmatpush3.bf16.msra.mxu1 %v2949_v27  ;;  %v3000_v27 = vld [vmem:[#allocation10 + $0x164] ss:$8 sps:$4 sm:$0xff]  }
 0x4a0   :  { %2764 = vmatprep.subr.bf16.mxu1 %v3388_v0 }
 0x4a3   :  { %2765 = vmatpush3.bf16.msra.mxu1 %v2950_v28  ;;  %v2998_v28 = vld [vmem:[#allocation10 + $0x160] ss:$8 sps:$4 sm:$0xff]  }
 0x4a4   :  { %2766 = vmatprep.subr.bf16.mxu1 %v3388_v0 }
 0x4a7   :  { %2767 = vmatpush3.bf16.msra.mxu1 %v2951_v29  ;;  %v3003_v29 = vld [vmem:[#allocation10 + $0x174] ss:$8 sps:$4 sm:$0xff]  }
 0x4a8   :  { %2768 = vmatprep.subr.bf16.mxu1 %v3388_v0 }
 0x4ab   :  { %2769 = vmatpush3.bf16.msra.mxu1 %v2952_v30  ;;  %v3001_v30 = vld [vmem:[#allocation10 + $0x170] ss:$8 sps:$4 sm:$0xff]  }
 0x4ac   :  { %2770 = vmatprep.subr.bf16.mxu1 %v3388_v0 }
 0x4af   :  { %2771 = vmatpush3.bf16.msra.mxu1 %v2953_v31  ;;  %v3004_v31 = vld [vmem:[#allocation16] ss:$12 sps:$4 sm:$0xff]  }
 0x4b0   :  { %2772 = vmatprep.subr.bf16.mxu1 %v3388_v0 }
 0x4b3   :  { %2773 = vmatpush3.bf16.msra.mxu1 %v2954_v32  ;;  %v3006_v32 = vld [vmem:[#allocation16 + $0x4] ss:$12 sps:$4 sm:$0xff]  }
 0x4b4   :  { %2774 = vmatprep.subr.bf16.mxu1 %v3388_v0 }
 0x4b7   :  { %2775 = vmatpush3.bf16.msra.mxu1 %v2955_v33  ;;  %v3009_v33 = vld [vmem:[#allocation16 + $0x1c] ss:$12 sps:$4 sm:$0xff]  }
 0x4b8   :  { %1805 = vmatprep.subr.bf16.mxu1 %v2982_v16 }
 0x4ba   :  { %2777 = vmatmul.mubr.bf16.vlgmr.msra.gmra.mrb[12].mxu1 %v1460_v36  ;;  %v3031_v36 = vld [vmem:[#allocation16 + $0xc8] ss:$12 sps:$4 sm:$0xff]  }
 0x4bb   :  { %1837 = vmatprep.mubr.bf16.mxu1 %v3390_v46  ;;  %1806 = vmatpush1.bf16.msra.mxu1 %v2980_v17  ;;  %v2498_v17 = vld [vmem:[%s3808_s7 + $0x2] ss:$0 sm:$0xff] }
 0x4bc   :  { %1807 = vmatprep.subr.bf16.mxu1 %v2985_v18 }
 0x4bf   :  { %1808 = vmatpush1.bf16.msra.mxu1 %v2983_v19 }
 0x4c0   :  { %1809 = vmatprep.subr.bf16.mxu1 %v2988_v20 }
 0x4c3   :  { %1810 = vmatpush1.bf16.msra.mxu1 %v2986_v21 }
 0x4c4   :  { %1811 = vmatprep.subr.bf16.mxu1 %v2991_v22 }
 0x4c7   :  { %1812 = vmatpush1.bf16.msra.mxu1 %v2989_v23 }
 0x56d   :  { %v1254_v43 = vpop.f32.mrb[8].mxu1 }
 0x56e   :  { %v1255_v46 = vadd.f32 %v1254_v43, %v1133_v41  ;;  %v1256_v44 = vpop.f32.mrb[9].mxu1  ;;  %v3024_v43 = vld [vmem:[#allocation16 + $0x94] ss:$12 sps:$4 sm:$0xff]  }
 0x56f   :  { %v1257_v48 = vadd.f32 %v1256_v44, %v1137_v42  ;;  %v1258_v50 = vpop.f32.mrb[10].mxu1  ;;  %v3027_v44 = vld [vmem:[#allocation16 + $0xac] ss:$12 sps:$4 sm:$0xff]  }
 0x570   :  { %v1259_v51 = vadd.f32 %v1258_v50, %v1133_v41  ;;  %v1260_v52 = vpop.f32.mrb[11].mxu1  ;;  %v1263_v54 = vmax.f32 %v1255_v46, 0.0  ;;  %v3021_v41 = vld [vmem:[#allocation16 + $0x7c] ss:$12 sps:$4 sm:$0xff]   ;;  %v3030_v50 = vld [vmem:[#allocation16 + $0xc4] ss:$12 sps:$4 sm:$0xff]  }
 0x571   :  { %v1261_v53 = vadd.f32 %v1260_v52, %v1137_v42  ;;  %v1264_v56 = vmax.f32 %v1257_v48, 0.0  ;;  %v3019_v42 = vld [vmem:[#allocation16 + $0x78] ss:$12 sps:$4 sm:$0xff]   ;;  %v3022_v46 = vld [vmem:[#allocation16 + $0x90] ss:$12 sps:$4 sm:$0xff]  }
 0x572   :  { %v1265_v55 = vmax.f32 %v1259_v51, 0.0  ;;  %v3025_v48 = vld [vmem:[#allocation16 + $0xa8] ss:$12 sps:$4 sm:$0xff]   ;;  %v3028_v51 = vld [vmem:[#allocation16 + $0xc0] ss:$12 sps:$4 sm:$0xff]  }
 0x573   :  { %v1266_v57 = vmax.f32 %v1261_v53, 0.0  ;;  %v3035_v52 = vld [vmem:[#allocation16 + $0xdc] ss:$12 sps:$4 sm:$0xff]   ;;  %v3033_v53 = vld [vmem:[#allocation16 + $0xd8] ss:$12 sps:$4 sm:$0xff]  }
 0x574   :  { %v1267_v58 = vpack.c.bf16 %v1265_v55, %v1263_v54  ;;  %v3040_v54 = vld [vmem:[#allocation16 + $0xf4] ss:$12 sps:$4 sm:$0xff]   ;;  %v3038_v55 = vld [vmem:[#allocation16 + $0xf0] ss:$12 sps:$4 sm:$0xff]  }
 0x575   :  { %v1268_v59 = vpack.c.bf16 %v1266_v57, %v1264_v56  ;;  %v3045_v56 = vld [vmem:[#allocation16 + $0x10c] ss:$12 sps:$4 sm:$0xff]   ;;  %v3043_v57 = vld [vmem:[#allocation16 + $0x108] ss:$12 sps:$4 sm:$0xff]  }
 0x577   :  { %1436 = vmatprep.mubr.bf16.mxu0 %v1268_v59  ;;  %v3048_v59 = vld [vmem:[#allocation16 + $0x120] ss:$12 sps:$4 sm:$0xff]  }
 0x578   :  { %1437 = vmatmul.mubr.bf16.vlgmr.msra.gmra.mrb[16].mxu0 %v1267_v58  ;;  %v3050_v58 = vld [vmem:[#allocation16 + $0x124] ss:$12 sps:$4 sm:$0xff]  }
 0x579   :  { %2781 = vmatpush3.bf16.msra.mxu0 %v2972_v60  ;;  %2796 = vmatprep.mubr.msk.bf16.mxu0 %vm3389_vm0, %v3388_v0  ;;  %v3055_v60 = vld [vmem:[#allocation16 + $0x13c] ss:$12 sps:$4 sm:$0xff]  }
 0x57a   :  { %2782 = vmatprep.subr.bf16.mxu0 %v3388_v0 }
 0x57d   :  { %2783 = vmatpush3.bf16.msra.mxu0 %v2973_v61  ;;  %v3053_v61 = vld [vmem:[#allocation16 + $0x138] ss:$12 sps:$4 sm:$0xff]  }
 0x57e   :  { %2784 = vmatprep.subr.bf16.mxu0 %v3388_v0 }
 0x581   :  { %2785 = vmatpush3.bf16.msra.mxu0 %v2974_v62 }
 0x582   :  { %2786 = vmatprep.subr.bf16.mxu0 %v3388_v0 }
 0x585   :  { %2787 = vmatpush3.bf16.msra.mxu0 %v2975_v63  ;;  %v2470_v63 = vld [vmem:[#allocation15] ss:$0 sm:$0xff] }
 0x586   :  { %2788 = vmatprep.subr.bf16.mxu0 %v3388_v0 }
 0x589   :  { %2789 = vmatpush3.bf16.msra.mxu0 %v2976_v1 }
 0x58a   :  { %2790 = vmatprep.subr.bf16.mxu0 %v3388_v0 }
 0x58d   :  { %v1568_v4 = vpop.f32.mrb[12].mxu1  ;;  %2791 = vmatpush3.bf16.msra.mxu0 %v2977_v2 }
 0x58e   :  { %v1569_v6 = vadd.f32 %v2488_v3, %v1568_v4  ;;  %v2778_v7 = vpop.f32.mrb[13].mxu1  ;;  %2792 = vmatprep.subr.bf16.mxu0 %v3388_v0 }
 0x58f   :  { %v1571_v8 = vpop.f32.mrb[14].mxu1 }
 0x590   :  { %v1575_v9 = vmax.f32 %v1569_v6, 0.0  ;;  %v1572_v10 = vadd.f32 %v2488_v3, %v1571_v8  ;;  %v2779_v11 = vpop.f32.mrb[15].mxu1 }
 0x591   :  { %2793 = vmatpush3.bf16.msra.mxu0 %v2978_v5 }
 0x592   :  { %v1576_v13 = vmax.f32 %v1572_v10, 0.0  ;;  %2794 = vmatprep.subr.bf16.mxu0 %v3388_v0  ;;  %v2994_v0 = vld [vmem:[#allocation10 + $0x144] ss:$8 sps:$4 sm:$0xff]  }
 0x593   :  { %1813 = vmatprep.subr.bf16.mxu1 %v2994_v0 }
 0x594   :  { %v1577_v15 = vpack.c.bf16 %v1576_v13, %v1575_v9  ;;  %1814 = vmatpush1.bf16.msra.mxu1 %v2992_v24 }
 0x595   :  { %2795 = vmatpush3.bf16.msra.mxu0 %v2979_v12  ;;  %1815 = vmatprep.subr.bf16.mxu1 %v2997_v25 }
 0x596   :  { %2191 = vmatprep.subr.bf16.mxu0 %v3006_v32  ;;  %v3037_v32 = vld [vmem:[#allocation16 + $0x20] ss:$12 sps:$4 sm:$0xff]  }
 0x598   :  { %2797 = vmatmul.mubr.bf16.vlgmr.msra.gmra.mrb[20].mxu0 %v1577_v15  ;;  %1816 = vmatpush1.bf16.msra.mxu1 %v2995_v26 }
 0x599   :  { %1817 = vmatprep.subr.bf16.mxu1 %v3000_v27  ;;  %2192 = vmatpush1.bf16.msra.mxu0 %v3004_v31  ;;  %v3036_v31 = vld [vmem:[#allocation16 + $0xe0] ss:$12 sps:$4 sm:$0xff]  }
 0x59a   :  { %2193 = vmatprep.subr.bf16.mxu0 %v3009_v33  ;;  %v3041_v33 = vld [vmem:[#allocation16 + $0xf8] ss:$12 sps:$4 sm:$0xff]  }
 0x59c   :  { %1818 = vmatpush1.bf16.msra.mxu1 %v2998_v28 }
 0x59d   :  { %1819 = vmatprep.subr.bf16.mxu1 %v3003_v29  ;;  %2194 = vmatpush1.bf16.msra.mxu0 %v3007_v34  ;;  %v3032_v29 = vld [vmem:[#allocation16 + $0x8] ss:$12 sps:$4 sm:$0xff]   ;;  %v3042_v34 = vld [vmem:[#allocation16 + $0x38] ss:$12 sps:$4 sm:$0xff]  }
 0x59e   :  { %2195 = vmatprep.subr.bf16.mxu0 %v3012_v35  ;;  %v3046_v35 = vld [vmem:[#allocation16 + $0x110] ss:$12 sps:$4 sm:$0xff]  }
 0x5a0   :  { %1820 = vmatpush1.bf16.msra.mxu1 %v3001_v30 }
 0x5a1   :  { %2658 = vmatprep.subr.bf16.mxu1 %v3031_v36  ;;  %2196 = vmatpush1.bf16.msra.mxu0 %v3010_v37  ;;  %v3047_v36 = vld [vmem:[#allocation16 + $0x50] ss:$12 sps:$4 sm:$0xff]   ;;  %v3051_v37 = vld [vmem:[#allocation16 + $0x128] ss:$12 sps:$4 sm:$0xff]  }
 0x5a2   :  { %2197 = vmatprep.subr.bf16.mxu0 %v3015_v14  ;;  %v3052_v14 = vld [vmem:[#allocation16 + $0x68] ss:$12 sps:$4 sm:$0xff]  }
 0x5a5   :  { %2198 = vmatpush1.bf16.msra.mxu0 %v3013_v38  ;;  %v3056_v38 = vld [vmem:[#allocation16 + $0x140] ss:$12 sps:$4 sm:$0xff]  }
 0x5a6   :  { %2199 = vmatprep.subr.bf16.mxu0 %v3018_v39  ;;  %v3057_v39 = vld [vmem:[#allocation16 + $0x80] ss:$12 sps:$4 sm:$0xff]  }
 0x5a9   :  { %2200 = vmatpush1.bf16.msra.mxu0 %v3016_v40  ;;  %v3060_v40 = vld [vmem:[#allocation16 + $0x154] ss:$12 sps:$4 sm:$0xff]  }
 0x5aa   :  { %2201 = vmatprep.subr.bf16.mxu0 %v3021_v41  ;;  %v3061_v41 = vld [vmem:[#allocation16 + $0x158] ss:$12 sps:$4 sm:$0xff]  }
 0x5ad   :  { %2202 = vmatpush1.bf16.msra.mxu0 %v3019_v42  ;;  %v3058_v42 = vld [vmem:[#allocation16 + $0x150] ss:$12 sps:$4 sm:$0xff]  }
 0x5ae   :  { %2203 = vmatprep.subr.bf16.mxu0 %v3024_v43  ;;  %v3062_v43 = vld [vmem:[#allocation16 + $0x98] ss:$12 sps:$4 sm:$0xff]  }
 0x5b1   :  { %2204 = vmatpush1.bf16.msra.mxu0 %v3022_v46  ;;  %v3065_v46 = vld [vmem:[#allocation16 + $0x16c] ss:$12 sps:$4 sm:$0xff]  }
 0x5b2   :  { %2205 = vmatprep.subr.bf16.mxu0 %v3027_v44  ;;  %v3066_v44 = vld [vmem:[#allocation16 + $0x170] ss:$12 sps:$4 sm:$0xff]  }
 0x5b5   :  { %2206 = vmatpush1.bf16.msra.mxu0 %v3025_v48  ;;  %v3063_v48 = vld [vmem:[#allocation16 + $0x168] ss:$12 sps:$4 sm:$0xff]  }
 0x5b6   :  { %2207 = vmatprep.subr.bf16.mxu0 %v3030_v50  ;;  %v3067_v50 = vld [vmem:[#allocation16 + $0xb0] ss:$12 sps:$4 sm:$0xff]  }
 0x5b9   :  { %2208 = vmatpush1.bf16.msra.mxu0 %v3028_v51  ;;  %v2507_v51 = vld [vmem:[%s3810_s9 + $0x4] sm:$0x3] }
 0x5ba   :  { %2209 = vmatprep.subr.bf16.mxu0 %v3035_v52  ;;  %v1718_v52 = vrot.slane %v2507_v51, %v3712_v47 }
 0x5bd   :  { %2210 = vmatpush1.bf16.msra.mxu0 %v3033_v53  ;;  %v1722_v53 = vrot.slane %v2507_v51, %v3718_v49 }
 0x5be   :  { %2211 = vmatprep.subr.bf16.mxu0 %v3040_v54 }
 0x5c1   :  { %2212 = vmatpush1.bf16.msra.mxu0 %v3038_v55 }
 0x5c2   :  { %2213 = vmatprep.subr.bf16.mxu0 %v3045_v56 }
 0x5c5   :  { %2214 = vmatpush1.bf16.msra.mxu0 %v3043_v57 }
 0x5c6   :  { %2215 = vmatprep.subr.bf16.mxu0 %v3050_v58 }
 0x5c9   :  { %2216 = vmatpush1.bf16.msra.mxu0 %v3048_v59 }
 0x5ca   :  { %2217 = vmatprep.subr.bf16.mxu0 %v3055_v60 }
 0x5cd   :  { %2218 = vmatpush1.bf16.msra.mxu0 %v3053_v61 }
 0x5ce   :  { %2219 = vmatprep.subr.bf16.mxu0 %v3060_v40 }
 0x5d1   :  { %2220 = vmatpush1.bf16.msra.mxu0 %v3058_v42 }
 0x5d2   :  { %2221 = vmatprep.subr.bf16.mxu0 %v3065_v46 }
 0x5d5   :  { %2222 = vmatpush1.bf16.msra.mxu0 %v3063_v48 }
 0x64b   :  { %v2634_v62 = vpop.f32.mrb[16].mxu0 }
 0x64c   :  { %v2635_v1 = vpop.f32.mrb[17].mxu0 }
 0x64d   :  { %v2636_v2 = vadd.f32 %v2635_v1, %v2634_v62  ;;  %v2637_v3 = vpop.f32.mrb[18].mxu0 }
 0x64e   :  { %v2638_v4 = vpop.f32.mrb[19].mxu0 }
 0x64f   :  { %v1439_v5 = vadd.f32 %v2636_v2, %v2470_v63  ;;  %v2639_v6 = vadd.f32 %v2638_v4, %v2637_v3 }
 0x651   :  { %v1445_v7 = vsub.f32 0.0, %v1439_v5  ;;  %v1442_v8 = vadd.f32 %v2639_v6, %v2470_v63  ;;  %v1918_v5 = vld [vmem:[#allocation18] sm:$0x7]  ;;  %v1930_v6 = vsub.s32 2, %v3709_v45 }
 0x653   :  { %v1447_v9 = vmul.f32 1.442695, %v1445_v7  ;;  %v1446_v10 = vsub.f32 0.0, %v1442_v8  ;;  %v1923_v7 = vrot.slane %v1918_v5, %v3712_v47  ;;  %v1927_v8 = vrot.slane %v1918_v5, %v3718_v49 }
 0x655   :  { %3084 = vpow2.f32 %v1447_v9  ;;  %v1449_v11 = vmul.f32 1.442695, %v1446_v10 }
 0x657   :  { %3086 = vpow2.f32 %v1449_v11  ;;  %v1931_v11 = vrot.slane %v1918_v5, %v1930_v6 }
 0x65f   :  { %v3085_v12 = vpop.eup %3084 }
 0x660   :  { %v1451_v13 = vadd.f32 1.0, %v3085_v12 }
 0x661   :  { %v3087_v15 = vpop.eup %3086 }
 0x662   :  { %3088 = vrcp.f32 %v1451_v13  ;;  %v1452_v16 = vadd.f32 1.0, %v3087_v15 }
 0x664   :  { %3090 = vrcp.f32 %v1452_v16 }
 0x66b   :  { %v1685_v18 = vpop.f32.mrb[20].mxu0 }
 0x66c   :  { %v3089_v19 = vpop.eup %3088  ;;  %v1686_v20 = vadd.f32 %v2498_v17, %v1685_v18  ;;  %v2798_v21 = vpop.f32.mrb[21].mxu0 }
 0x66d   :  { %v1455_v22 = vpack.c.bf16 %v3089_v19, %v3089_v19  ;;  %v1688_v23 = vpop.f32.mrb[22].mxu0 }
 0x66e   :  { %v3091_v0 = vpop.eup %3090  ;;  %v1689_v24 = vadd.f32 %v2498_v17, %v1688_v23  ;;  %v2799_v25 = vpop.f32.mrb[23].mxu0  ;;  %v1692_v27 = vmax.f32 %v1686_v20, 0.0 }
 0x66f   :  { %1456 = vst [vmem:[%s3818_s17] sm:$0xf] %v1455_v22  ;;  %v1457_v26 = vpack.c.bf16 %v3091_v0, %v3091_v0 }
 0x670   :  { %v1693_v28 = vmax.f32 %v1689_v24, 0.0 }
 0x671   :  { %1458 = vst [vmem:[%s3821_s20] sm:$0xf] %v1457_v26 }
 0x672   :  { %v1694_v30 = vpack.c.bf16 %v1693_v28, %v1692_v27 }
 0x674   :  { %1838 = vmatmul.mubr.bf16.vlgmr.msra.gmra.mrb[16].mxu1 %v1694_v30 }
 0x675   :  { %2659 = vmatpush3.bf16.msra.mxu1 %v3032_v29 }
 0x676   :  { %2660 = vmatprep.subr.bf16.mxu1 %v3036_v31 }
 0x679   :  { %2661 = vmatpush3.bf16.msra.mxu1 %v3037_v32 }
 0x67a   :  { %2662 = vmatprep.subr.bf16.mxu1 %v3041_v33 }
 0x67d   :  { %2663 = vmatpush3.bf16.msra.mxu1 %v3042_v34 }
 0x67e   :  { %2664 = vmatprep.subr.bf16.mxu1 %v3046_v35 }
 0x681   :  { %2665 = vmatpush3.bf16.msra.mxu1 %v3047_v36 }
 0x682   :  { %2666 = vmatprep.subr.bf16.mxu1 %v3051_v37 }
 0x685   :  { %2667 = vmatpush3.bf16.msra.mxu1 %v3052_v14 }
 0x686   :  { %2668 = vmatprep.subr.bf16.mxu1 %v3056_v38 }
 0x689   :  { %2669 = vmatpush3.bf16.msra.mxu1 %v3057_v39 }
 0x68a   :  { %2670 = vmatprep.subr.bf16.mxu1 %v3061_v41 }
 0x68d   :  { %2671 = vmatpush3.bf16.msra.mxu1 %v3062_v43 }
 0x68e   :  { %2672 = vmatprep.subr.bf16.mxu1 %v3066_v44 }
 0x691   :  { %2673 = vmatpush3.bf16.msra.mxu1 %v3067_v50 }
 0x747   :  { %v1839_v54 = vpop.f32.mrb[16].mxu1 }
 0x748   :  { %v1840_v55 = vadd.f32 %v1839_v54, %v1718_v52  ;;  %v1841_v56 = vpop.f32.mrb[17].mxu1 }
 0x749   :  { %v1842_v57 = vadd.f32 %v1841_v56, %v1722_v53  ;;  %v1843_v58 = vpop.f32.mrb[18].mxu1 }
 0x74a   :  { %v1844_v59 = vadd.f32 %v1843_v58, %v1718_v52  ;;  %v1845_v60 = vpop.f32.mrb[19].mxu1  ;;  %v1848_v62 = vmax.f32 %v1840_v55, 0.0 }
 0x74b   :  { %v1846_v61 = vadd.f32 %v1845_v60, %v1722_v53  ;;  %v1849_v1 = vmax.f32 %v1842_v57, 0.0 }
 0x74c   :  { %v1850_v63 = vmax.f32 %v1844_v59, 0.0 }
 0x74d   :  { %v1851_v2 = vmax.f32 %v1846_v61, 0.0 }
 0x74e   :  { %v1852_v3 = vpack.c.bf16 %v1850_v63, %v1848_v62 }
 0x74f   :  { %v1853_v4 = vpack.c.bf16 %v1851_v2, %v1849_v1 }
 0x751   :  { %2223 = vmatprep.mubr.bf16.mxu0 %v1853_v4  ;;  %2266 = vmatprep.mubr.bf16.mxu1 %v1853_v4 }
 0x752   :  { %2224 = vmatmul.mubr.bf16.vlgmr.msra.gmra.mrb[24].mxu0 %v1852_v3  ;;  %2267 = vmatmul.mubr.bf16.vlgmr.msra.gmra.mrb[20].mxu1 %v1852_v3 }
 0x825   :  { %v2225_v9 = vpop.f32.mrb[24].mxu0  ;;  %v2674_v10 = vpop.f32.mrb[20].mxu1 }
 0x826   :  { %v2226_v12 = vadd.f32 %v2225_v9, %v1923_v7  ;;  %v2227_v13 = vpop.f32.mrb[25].mxu0  ;;  %v2675_v15 = vpop.f32.mrb[21].mxu1 }
 0x827   :  { %v2228_v16 = vadd.f32 %v2227_v13, %v1927_v8  ;;  %v2676_v17 = vadd.f32 %v2675_v15, %v2674_v10  ;;  %v2229_v18 = vpop.f32.mrb[26].mxu0  ;;  %v2677_v19 = vpop.f32.mrb[22].mxu1 }
 0x828   :  { %v2275_v20 = vsub.f32 0.0, %v2226_v12  ;;  %v2230_v21 = vadd.f32 %v2229_v18, %v1923_v7  ;;  %v2231_v22 = vpop.f32.mrb[27].mxu0  ;;  %v2678_v23 = vpop.f32.mrb[23].mxu1 }
 0x829   :  { %v2276_v0 = vsub.f32 0.0, %v2228_v16  ;;  %v2269_v45 = vadd.f32 %v2676_v17, %v1931_v11  ;;  %v2232_v24 = vadd.f32 %v2231_v22, %v1927_v8  ;;  %v2679_v47 = vadd.f32 %v2678_v23, %v2677_v19 }
 0x82a   :  { %v2281_v25 = vmul.f32 1.442695, %v2275_v20  ;;  %v2278_v49 = vsub.f32 0.0, %v2230_v21 }
 0x82b   :  { %v2283_v26 = vmul.f32 1.442695, %v2276_v0  ;;  %v2277_v27 = vsub.f32 0.0, %v2269_v45  ;;  %v2279_v28 = vsub.f32 0.0, %v2232_v24  ;;  %v2272_v29 = vadd.f32 %v2679_v47, %v1931_v11 }
 0x82c   :  { %3092 = vpow2.f32 %v2281_v25  ;;  %v2287_v30 = vmul.f32 1.442695, %v2278_v49 }
 0x82d   :  { %3094 = vpow2.f32 %v2283_v26  ;;  %v2285_v31 = vmul.f32 1.442695, %v2277_v27  ;;  %v2289_v32 = vmul.f32 1.442695, %v2279_v28  ;;  %v2280_v33 = vsub.f32 0.0, %v2272_v29 }
 0x82e   :  { %3096 = vpow2.f32 %v2287_v30 }
 0x82f   :  { %3098 = vpow2.f32 %v2285_v31  ;;  %v2291_v34 = vmul.f32 1.442695, %v2280_v33 }
 0x830   :  { %3100 = vpow2.f32 %v2289_v32 }
 0x831   :  { %3102 = vpow2.f32 %v2291_v34 }
 0x836   :  { %v3093_v35 = vpop.eup %3092 }
 0x837   :  { %v3095_v36 = vpop.eup %3094  ;;  %v2293_v37 = vadd.f32 1.0, %v3093_v35 }
 0x838   :  { %v3097_v14 = vpop.eup %3096  ;;  %v2294_v38 = vadd.f32 1.0, %v3095_v36 }
 0x839   :  { %v3099_v39 = vpop.eup %3098  ;;  %3104 = vrcp.f32 %v2293_v37  ;;  %v2296_v40 = vadd.f32 1.0, %v3097_v14 }
 0x83a   :  { %v3101_v41 = vpop.eup %3100  ;;  %3106 = vrcp.f32 %v2294_v38  ;;  %v2295_v42 = vadd.f32 1.0, %v3099_v39 }
 0x83b   :  { %v3103_v43 = vpop.eup %3102  ;;  %3108 = vrcp.f32 %v2296_v40  ;;  %v2297_v46 = vadd.f32 1.0, %v3101_v41 }
 0x83c   :  { %3110 = vrcp.f32 %v2295_v42  ;;  %v2298_v44 = vadd.f32 1.0, %v3103_v43 }
 0x83d   :  { %3112 = vrcp.f32 %v2297_v46 }
 0x83e   :  { %3114 = vrcp.f32 %v2298_v44 }
 0x843   :  { %v3105_v48 = vpop.eup %3104 }
 0x844   :  { %v3107_v50 = vpop.eup %3106 }
 0x845   :  { %v3109_v51 = vpop.eup %3108  ;;  %v2578_v52 = vpack.c.bf16 %v3107_v50, %v3105_v48 }
 0x846   :  { %v3111_v53 = vpop.eup %3110 }
 0x847   :  { %v3113_v54 = vpop.eup %3112  ;;  %2318 = vst [vmem:[%s3855_s24] sm:$0xff] %v2578_v52  ;;  %v2579_v55 = vpack.c.bf16 %v3111_v53, %v3111_v53 }
 0x848   :  { %v3115_v56 = vpop.eup %3114  ;;  %v2580_v57 = vpack.c.bf16 %v3113_v54, %v3109_v51 }
 0x849   :  { %2319 = vst [vmem:[%s3855_s24 + $0x8] sm:$0xf] %v2579_v55  ;;  %v2581_v58 = vpack.c.bf16 %v3115_v56, %v3115_v56 }
 0x84a   :  { %2333 = vst [vmem:[%s3856_s14] sm:$0xff] %v2580_v57 }
 0x84b   :  { %2334 = vst [vmem:[%s3856_s14 + $0x8] sm:$0xf] %v2581_v58 }
 0x84c   :  { %2359 = vsyncpa [#allocation3], 1 }
 0x84d   :  { %2360 = vsyncpa [#allocation5], 1 }
 0x84e   :  { %2361 = vsyncpa [#allocation8], 1 }
 0x84f   :  { %2362 = vsyncpa [#allocation11], 1 }
 0x850   :  { %2363 = vsyncpa [#allocation14], 1 }
 0x851   :  { %2364 = vsyncpa [#allocation17], 1 }

</bundles_post_ra>
